<compile_context>
chip_gen: v5e
topology: v5e:2x2
jax: 0.10.0
libtpu: 0.0.40
codegen_flags: <defaults>
</compile_context>

<pallas_src>
import jax
import jax.numpy as jnp
from jax import lax
from jax.experimental import pallas as pl
from jax.experimental.pallas import tpu as pltpu

LANE = 128     # lane alignment for the hidden dimension
SUBLANE = 8    # f32 sublane alignment for the batch tile


def _round_up(x, m):
    return ((x + m - 1) // m) * m


# ----------------------------- Pallas kernel --------------------------------

def bigru_kernel(x_ref, len_ref, wx_ref, whh_ref, bx_ref, bhn_ref,
                 out_ref, state_ref,
                 gxf_ref, gxb_ref, outb_ref):
    """One batch tile of a bidirectional single-layer GRU.

    x_ref    : (T, Bt, D)     f32  input features (embed || feat-embed)
    len_ref  : (Bt, 1)        i32  sequence lengths (0 for padded batch rows)
    wx_ref   : (D, 6*HP)      f32  input proj, gate blocks [r_f|z_f|n_f|r_b|z_b|n_b], HP wide
    whh_ref  : (2, HP, 3*HP)  f32  recurrent proj per direction, gate blocks HP wide
    bx_ref   : (1, 6*HP)      f32  folded biases (r,z: b_ih+b_hh ; n: b_ih only)
    bhn_ref  : (1, 2*HP)      f32  b_hh of the n gate per direction (lives inside r*(...))
    out_ref  : (T, Bt, HP)    f32  fwd_out + bwd_out
    state_ref: (1, Bt, HP)    f32  final fwd hidden + final bwd hidden
    gxf/gxb  : (T, Bt, 3*HP)  f32  scratch: precomputed input projections per direction
    outb_ref : (T, Bt, HP)    f32  scratch: backward-direction outputs
    """
    T, Bt, D = x_ref.shape
    HP = out_ref.shape[-1]

    # ---- prepass: ONE GEMM for every timestep and both directions -----------
    # Replaces 2*T tiny (Bt,D)x(D,3H) matmuls on the sequential critical path.
    x2d = x_ref[...].reshape(T * Bt, D)
    gx = jnp.dot(x2d, wx_ref[...], preferred_element_type=jnp.float32) + bx_ref[...]
    gxf_ref[...] = gx[:, 0:3 * HP].reshape(T, Bt, 3 * HP)
    gxb_ref[...] = gx[:, 3 * HP:6 * HP].reshape(T, Bt, 3 * HP)

    # ---- loop-invariant values hoisted out of the recurrence -----------------
    lengths = len_ref[...]                                      # (Bt, 1) int32
    whh_f = whh_ref[0]                                          # (HP, 3HP)
    whh_b = whh_ref[1]
    bhn_f = jnp.broadcast_to(bhn_ref[0:1, 0:HP], (Bt, HP))      # broadcast once, not per step
    bhn_b = jnp.broadcast_to(bhn_ref[0:1, HP:2 * HP], (Bt, HP))

    def gru_gates(gx_t, gh, bhn, h):
        # Gate order [r | z | n]; each block is HP lanes -> whole-vreg slices.
        r = jax.nn.sigmoid(gx_t[:, 0:HP] + gh[:, 0:HP])
        z = jax.nn.sigmoid(gx_t[:, HP:2 * HP] + gh[:, HP:2 * HP])
        n = jnp.tanh(gx_t[:, 2 * HP:3 * HP] + r * (gh[:, 2 * HP:3 * HP] + bhn))
        return (1.0 - z) * n + z * h

    # ---- single interleaved time loop: fwd step i and bwd step T-1-i ---------
    # Two independent dependency chains per iteration (MXU of one direction
    # overlaps EUP/VPU work of the other).
    def body(i, carry):
        h_f, h_b = carry
        tb = T - 1 - i
        gx_f = gxf_ref[i]                                       # (Bt, 3HP)
        gx_b = gxb_ref[tb]
        gh_f = jnp.dot(h_f, whh_f, preferred_element_type=jnp.float32)
        gh_b = jnp.dot(h_b, whh_b, preferred_element_type=jnp.float32)
        hf_new = gru_gates(gx_f, gh_f, bhn_f, h_f)
        hb_new = gru_gates(gx_b, gh_b, bhn_b, h_b)
        m_f = i < lengths                                       # (Bt, 1) bool
        m_b = tb < lengths
        out_ref[i] = jnp.where(m_f, hf_new, 0.0)                # padded steps -> 0
        outb_ref[tb] = jnp.where(m_b, hb_new, 0.0)
        return (jnp.where(m_f, hf_new, h_f), jnp.where(m_b, hb_new, h_b))

    h0 = jnp.zeros((Bt, HP), jnp.float32)
    h_f, h_b = lax.fori_loop(0, T, body, (h0, h0))

    # One lane-dense vectorized pass instead of per-step read-modify-write.
    out_ref[...] = out_ref[...] + outb_ref[...]
    state_ref[0] = h_f + h_b


# ------------------- weight packing (lane-aligned layout) --------------------

def pack_weights(params, H):
    """Re-pack PyTorch-layout GRU weights into lane-aligned, direction-stacked blocks."""
    HP = _round_up(H, LANE)

    def gate_cols(w):                                    # (rows, 3H) -> (rows, 3HP)
        rows = w.shape[0]
        out = jnp.zeros((rows, 3 * HP), jnp.float32)
        for g in range(3):
            out = out.at[:, g * HP:g * HP + H].set(w[:, g * H:(g + 1) * H])
        return out

    wx = jnp.concatenate([gate_cols(params["w_ih_f"]),
                          gate_cols(params["w_ih_b"])], axis=1)            # (D, 6HP)

    def pad_rows(w):                                     # (H, 3HP) -> (HP, 3HP)
        return jnp.pad(w, ((0, HP - H), (0, 0)))

    whh = jnp.stack([pad_rows(gate_cols(params["w_hh_f"])),
                     pad_rows(gate_cols(params["w_hh_b"]))])               # (2, HP, 3HP)

    def folded_bias(b_ih, b_hh):                         # r,z: b_ih+b_hh ; n: b_ih only
        out = jnp.zeros((1, 3 * HP), jnp.float32)
        out = out.at[:, 0 * HP:0 * HP + H].set(b_ih[:, 0:H] + b_hh[:, 0:H])
        out = out.at[:, 1 * HP:1 * HP + H].set(b_ih[:, H:2 * H] + b_hh[:, H:2 * H])
        out = out.at[:, 2 * HP:2 * HP + H].set(b_ih[:, 2 * H:3 * H])
        return out

    bx = jnp.concatenate([folded_bias(params["b_ih_f"], params["b_hh_f"]),
                          folded_bias(params["b_ih_b"], params["b_hh_b"])], axis=1)  # (1, 6HP)

    def n_bias(b_hh):
        return jnp.zeros((1, HP), jnp.float32).at[:, :H].set(b_hh[:, 2 * H:3 * H])

    bhn = jnp.concatenate([n_bias(params["b_hh_f"]),
                           n_bias(params["b_hh_b"])], axis=1)              # (1, 2HP)
    return wx, whh, bx, bhn


# ------------------------------ pallas wrapper --------------------------------

def pallas_bigru(x, lengths, params, hidden_size, b_tile=SUBLANE):
    T, B, D = x.shape
    H = hidden_size
    HP = _round_up(H, LANE)
    B_pad = _round_up(max(B, b_tile), b_tile)

    if B_pad != B:
        # padded batch rows get length 0 -> their hidden state / outputs stay 0
        x = jnp.pad(x, ((0, 0), (0, B_pad - B), (0, 0)))
        lengths = jnp.pad(lengths, (0, B_pad - B))
    len2d = lengths.reshape(B_pad, 1).astype(jnp.int32)

    wx, whh, bx, bhn = pack_weights(params, H)

    grid = (B_pad // b_tile,)
    grid_spec = pltpu.PrefetchScalarGridSpec(
        num_scalar_prefetch=0,
        grid=grid,
        in_specs=[
            pl.BlockSpec((T, b_tile, D), lambda b: (0, b, 0)),        # x, batch-tiled
            pl.BlockSpec((b_tile, 1), lambda b: (b, 0)),              # lengths
            pl.BlockSpec((D, 6 * HP), lambda b: (0, 0)),              # wx (replicated)
            pl.BlockSpec((2, HP, 3 * HP), lambda b: (0, 0, 0)),       # whh (replicated)
            pl.BlockSpec((1, 6 * HP), lambda b: (0, 0)),              # bx (replicated)
            pl.BlockSpec((1, 2 * HP), lambda b: (0, 0)),              # bhn (replicated)
        ],
        out_specs=(
            pl.BlockSpec((T, b_tile, HP), lambda b: (0, b, 0)),       # out
            pl.BlockSpec((1, b_tile, HP), lambda b: (0, b, 0)),       # state
        ),
        scratch_shapes=[
            pltpu.VMEM((T, b_tile, 3 * HP), jnp.float32),   # gx forward
            pltpu.VMEM((T, b_tile, 3 * HP), jnp.float32),   # gx backward
            pltpu.VMEM((T, b_tile, HP), jnp.float32),       # backward outputs
        ],
    )

    out_p, state_p = pl.pallas_call(
        bigru_kernel,
        grid_spec=grid_spec,
        out_shape=(jax.ShapeDtypeStruct((T, B_pad, HP), jnp.float32),
                   jax.ShapeDtypeStruct((1, B_pad, HP), jnp.float32)),
        compiler_params=pltpu.CompilerParams(
            dimension_semantics=("parallel",)),   # batch tiles are independent (megacore on v7x)
    )(x, len2d, wx, whh, bx, bhn)

    # un-pad (lane-dense kernel outputs; trimming is a cheap XLA slice outside)
    return out_p[:, :B, :H], state_p[:, :B, :H]


# ------------------------- parameter init & forward --------------------------

def init_params(key, vocab_size, embed_size, feat_vec_size, hidden_size):
    D = embed_size + feat_vec_size
    H = hidden_size
    ks = jax.random.split(key, 12)
    u = lambda k, shape: jax.random.uniform(k, shape, jnp.float32, -0.1, 0.1)

    emb = u(ks[0], (vocab_size, embed_size)).at[0].set(0.0)      # padding_idx=0
    feat_emb = u(ks[1], (2, feat_vec_size)).at[0].set(0.0)       # padding_idx=0

    return {
        "emb": emb,
        "feat_emb": feat_emb,
        # PyTorch GRU layout, weights stored transposed: (D,3H)/(H,3H), gates [r|z|n]
        "w_ih_f": u(ks[2], (D, 3 * H)),
        "w_hh_f": u(ks[3], (H, 3 * H)),
        "b_ih_f": u(ks[4], (1, 3 * H)),
        "b_hh_f": u(ks[5], (1, 3 * H)),
        "w_ih_b": u(ks[6], (D, 3 * H)),
        "w_hh_b": u(ks[7], (H, 3 * H)),
        "b_ih_b": u(ks[8], (1, 3 * H)),
        "b_hh_b": u(ks[9], (1, 3 * H)),
    }


def gru_encoder_forward(params, input_ids, lengths, features):
    """input_ids: (T, B) int32, lengths: (B,) int32, features: (T, B) int32 in {0,1}.

    Returns (encoder_out (T,B,H), encoder_state (1,B,H)). Padded timesteps of
    encoder_out are exactly 0 (matching pad_packed_sequence padding). Trimming the
    time axis to max(lengths) is data-dependent and left to the caller outside jit.
    """
    H = params["w_hh_f"].shape[0]
    emb = jnp.take(params["emb"], input_ids, axis=0)              # (T, B, E)
    femb = jnp.take(params["feat_emb"], features, axis=0)         # (T, B, F)
    x = jnp.concatenate([emb, femb], axis=-1).astype(jnp.float32)  # (T, B, D)
    # dropout == 0.0 in this config -> lookup_dropout / GRU dropout are no-ops
    return pallas_bigru(x, lengths, params, H)


# ------------------------------ pure-JAX reference ---------------------------

def ref_bigru(x, lengths, params):
    T, B, _ = x.shape
    H = params["w_hh_f"].shape[0]
    lens = lengths.reshape(B, 1)
    h0 = jnp.zeros((B, H), jnp.float32)

    def cell(x_t, h, w_ih, w_hh, b_ih, b_hh):
        gx = jnp.dot(x_t, w_ih) + b_ih
        gh = jnp.dot(h, w_hh) + b_hh
        r = jax.nn.sigmoid(gx[:, :H] + gh[:, :H])
        z = jax.nn.sigmoid(gx[:, H:2 * H] + gh[:, H:2 * H])
        n = jnp.tanh(gx[:, 2 * H:] + r * gh[:, 2 * H:])
        return (1.0 - z) * n + z * h

    def step(sfx):
        def body(h, t):
            h_new = cell(x[t], h, params["w_ih" + sfx], params["w_hh" + sfx],
                         params["b_ih" + sfx], params["b_hh" + sfx])
            m = t < lens
            return jnp.where(m, h_new, h), jnp.where(m, h_new, 0.0)
        return body

    ts = jnp.arange(T)
    h_f, out_f = lax.scan(step("_f"), h0, ts)
    h_b, out_b_rev = lax.scan(step("_b"), h0, ts[::-1])
    out_b = out_b_rev[::-1]
    return out_f + out_b, (h_f + h_b)[None]


# ----------------------------------- main ------------------------------------

if __name__ == "__main__":
    T, B = 8, 2
    vocab_size, embed_size, feat_vec_size, hidden_size = 20, 24, 8, 32

    key = jax.random.PRNGKey(0)
    k_p, k_in, k_ft = jax.random.split(key, 3)
    params = init_params(k_p, vocab_size, embed_size, feat_vec_size, hidden_size)

    lengths = jnp.array([8, 5], dtype=jnp.int32)                  # max length == T
    input_ids = jax.random.randint(k_in, (T, B), 1, vocab_size, dtype=jnp.int32)
    features = jax.random.randint(k_ft, (T, B), 0, 2, dtype=jnp.int32)
    pad_mask = (jnp.arange(T)[:, None] < lengths[None, :]).astype(jnp.int32)
    input_ids = input_ids * pad_mask                              # padding token 0
    features = features * pad_mask                                # padding feature 0

    fwd = jax.jit(gru_encoder_forward)                            # jit-safe (no concretization)
    encoder_out, encoder_state = fwd(params, input_ids, lengths, features)
    jax.block_until_ready((encoder_out, encoder_state))

    # sanity check against a pure-JAX reference of the same math
    emb = jnp.take(params["emb"], input_ids, axis=0)
    femb = jnp.take(params["feat_emb"], features, axis=0)
    x = jnp.concatenate([emb, femb], axis=-1).astype(jnp.float32)
    ref_out, ref_state = ref_bigru(x, lengths, params)

    assert encoder_out.shape == (T, B, hidden_size)
    assert encoder_state.shape == (1, B, hidden_size)
    assert jnp.allclose(encoder_out, ref_out, atol=2e-2, rtol=2e-2)
    assert jnp.allclose(encoder_state, ref_state, atol=2e-2, rtol=2e-2)

    print("KERNEL_OK")
</pallas_src>

<mosaic_0001>
module attributes {stable_mosaic.version = 11 : i64} {
  func.func @bigru_kernel(%arg0: i32, %arg1: memref<8x8x32xf32, #tpu.memory_space<vmem>>, %arg2: memref<8x1xi32, #tpu.memory_space<vmem>>, %arg3: memref<32x768xf32, #tpu.memory_space<vmem>>, %arg4: memref<2x128x384xf32, #tpu.memory_space<vmem>>, %arg5: memref<1x768xf32, #tpu.memory_space<vmem>>, %arg6: memref<1x256xf32, #tpu.memory_space<vmem>>, %arg7: memref<8x8x128xf32, #tpu.memory_space<vmem>>, %arg8: memref<1x8x128xf32, #tpu.memory_space<vmem>>, %arg9: memref<8x8x384xf32, #tpu.memory_space<vmem>>, %arg10: memref<8x8x384xf32, #tpu.memory_space<vmem>>, %arg11: memref<8x8x128xf32, #tpu.memory_space<vmem>>) attributes {dimension_semantics = [#tpu.dimension_semantics<parallel>], iteration_bounds = array<i64: 1>, scalar_prefetch = 0 : i64, scratch_operands = 3 : i64, tpu.core_type = #tpu.core_type<tc>, window_params = [{transform_indices = @transform_0, window_bounds = array<i64: 8, 8, 32>}, {transform_indices = @transform_1, window_bounds = array<i64: 8, 1>}, {pipeline_mode = #tpu.pipeline_mode<synchronous>, transform_indices = @transform_2, window_bounds = array<i64: 32, 768>}, {pipeline_mode = #tpu.pipeline_mode<synchronous>, transform_indices = @transform_3, window_bounds = array<i64: 2, 128, 384>}, {pipeline_mode = #tpu.pipeline_mode<synchronous>, transform_indices = @transform_4, window_bounds = array<i64: 1, 768>}, {pipeline_mode = #tpu.pipeline_mode<synchronous>, transform_indices = @transform_5, window_bounds = array<i64: 1, 256>}, {transform_indices = @transform_6, window_bounds = array<i64: 8, 8, 128>}, {transform_indices = @transform_7, window_bounds = array<i64: 1, 8, 128>}]} {
    %c0 = arith.constant 0 : index
    %c0_0 = arith.constant 0 : index
    %c0_1 = arith.constant 0 : index
    %0 = vector.load %arg1[%c0, %c0_0, %c0_1] : memref<8x8x32xf32, #tpu.memory_space<vmem>>, vector<8x8x32xf32>
    %1 = vector.shape_cast %0 : vector<8x8x32xf32> to vector<64x32xf32>
    %c0_2 = arith.constant 0 : index
    %c0_3 = arith.constant 0 : index
    %2 = vector.load %arg3[%c0_2, %c0_3] : memref<32x768xf32, #tpu.memory_space<vmem>>, vector<32x768xf32>
    %cst = arith.constant dense<0.000000e+00> : vector<64x768xf32>
    %3 = tpu.matmul %1, %2, %cst {dimension_numbers = #tpu.dot_dimension_numbers<[1], [0], [0], [1], [0, 0, 1, 1], [], []>} : vector<64x32xf32>, vector<32x768xf32>, vector<64x768xf32> -> vector<64x768xf32>
    %c0_4 = arith.constant 0 : index
    %c0_5 = arith.constant 0 : index
    %4 = vector.load %arg5[%c0_4, %c0_5] : memref<1x768xf32, #tpu.memory_space<vmem>>, vector<1x768xf32>
    %5 = vector.broadcast %4 : vector<1x768xf32> to vector<64x768xf32>
    %6 = arith.addf %3, %5 : vector<64x768xf32>
    %7 = vector.extract_strided_slice %6 {offsets = [0, 0], sizes = [64, 384], strides = [1, 1]} : vector<64x768xf32> to vector<64x384xf32>
    %8 = vector.shape_cast %7 : vector<64x384xf32> to vector<8x8x384xf32>
    %c0_6 = arith.constant 0 : index
    %c0_7 = arith.constant 0 : index
    %c0_8 = arith.constant 0 : index
    %9 = vector.load %arg9[%c0_6, %c0_7, %c0_8] : memref<8x8x384xf32, #tpu.memory_space<vmem>>, vector<8x8x384xf32>
    tpu.vector_store %arg9[%c0_6, %c0_7, %c0_8], %8 {strides = array<i32>} : memref<8x8x384xf32, #tpu.memory_space<vmem>>, vector<8x8x384xf32>,
    %10 = vector.extract_strided_slice %6 {offsets = [0, 384], sizes = [64, 384], strides = [1, 1]} : vector<64x768xf32> to vector<64x384xf32>
    %11 = vector.shape_cast %10 : vector<64x384xf32> to vector<8x8x384xf32>
    %c0_9 = arith.constant 0 : index
    %c0_10 = arith.constant 0 : index
    %c0_11 = arith.constant 0 : index
    %12 = vector.load %arg10[%c0_9, %c0_10, %c0_11] : memref<8x8x384xf32, #tpu.memory_space<vmem>>, vector<8x8x384xf32>
    tpu.vector_store %arg10[%c0_9, %c0_10, %c0_11], %11 {strides = array<i32>} : memref<8x8x384xf32, #tpu.memory_space<vmem>>, vector<8x8x384xf32>,
    %c0_12 = arith.constant 0 : index
    %c0_13 = arith.constant 0 : index
    %13 = vector.load %arg2[%c0_12, %c0_13] : memref<8x1xi32, #tpu.memory_space<vmem>>, vector<8x1xi32>
    %c0_14 = arith.constant 0 : index
    %c0_15 = arith.constant 0 : index
    %c0_16 = arith.constant 0 : index
    %14 = vector.load %arg4[%c0_14, %c0_15, %c0_16] : memref<2x128x384xf32, #tpu.memory_space<vmem>>, vector<1x128x384xf32>
    %15 = vector.shape_cast %14 : vector<1x128x384xf32> to vector<128x384xf32>
    %c1 = arith.constant 1 : index
    %c0_17 = arith.constant 0 : index
    %c0_18 = arith.constant 0 : index
    %16 = vector.load %arg4[%c1, %c0_17, %c0_18] : memref<2x128x384xf32, #tpu.memory_space<vmem>>, vector<1x128x384xf32>
    %17 = vector.shape_cast %16 : vector<1x128x384xf32> to vector<128x384xf32>
    %c0_19 = arith.constant 0 : index
    %c0_20 = arith.constant 0 : index
    %18 = vector.load %arg6[%c0_19, %c0_20] : memref<1x256xf32, #tpu.memory_space<vmem>>, vector<1x128xf32>
    %19 = vector.shape_cast %18 : vector<1x128xf32> to vector<1x128xf32>
    %20 = vector.broadcast %19 : vector<1x128xf32> to vector<8x128xf32>
    %c0_21 = arith.constant 0 : index
    %c128 = arith.constant 128 : index
    %21 = vector.load %arg6[%c0_21, %c128] : memref<1x256xf32, #tpu.memory_space<vmem>>, vector<1x128xf32>
    %22 = vector.shape_cast %21 : vector<1x128xf32> to vector<1x128xf32>
    %23 = vector.broadcast %22 : vector<1x128xf32> to vector<8x128xf32>
    %cst_22 = arith.constant 0.000000e+00 : f32
    %24 = vector.broadcast %cst_22 : f32 to vector<8x128xf32>
    %c0_i32 = arith.constant 0 : i32
    %c8_i32 = arith.constant 8 : i32
    %25 = arith.addi %c0_i32, %c8_i32 : i32
    %c1_i32 = arith.constant 1 : i32
    %26:2 = scf.for %arg12 = %c0_i32 to %25 step %c1_i32 iter_args(%arg13 = %24, %arg14 = %24) -> (vector<8x128xf32>, vector<8x128xf32>)  : i32 {
      %c7_i32 = arith.constant 7 : i32
      %35 = arith.subi %c7_i32, %arg12 : i32
      %36 = arith.index_cast %arg12 : i32 to index
      %c0_36 = arith.constant 0 : index
      %c0_37 = arith.constant 0 : index
      %37 = vector.load %arg9[%36, %c0_36, %c0_37] : memref<8x8x384xf32, #tpu.memory_space<vmem>>, vector<1x8x384xf32>
      %38 = vector.shape_cast %37 : vector<1x8x384xf32> to vector<8x384xf32>
      %39 = arith.index_cast %35 : i32 to index
      %c0_38 = arith.constant 0 : index
      %c0_39 = arith.constant 0 : index
      %40 = vector.load %arg10[%39, %c0_38, %c0_39] : memref<8x8x384xf32, #tpu.memory_space<vmem>>, vector<1x8x384xf32>
      %41 = vector.shape_cast %40 : vector<1x8x384xf32> to vector<8x384xf32>
      %cst_40 = arith.constant dense<0.000000e+00> : vector<8x384xf32>
      %42 = tpu.matmul %arg13, %15, %cst_40 {dimension_numbers = #tpu.dot_dimension_numbers<[1], [0], [0], [1], [0, 0, 1, 1], [], []>} : vector<8x128xf32>, vector<128x384xf32>, vector<8x384xf32> -> vector<8x384xf32>
      %cst_41 = arith.constant dense<0.000000e+00> : vector<8x384xf32>
      %43 = tpu.matmul %arg14, %17, %cst_41 {dimension_numbers = #tpu.dot_dimension_numbers<[1], [0], [0], [1], [0, 0, 1, 1], [], []>} : vector<8x128xf32>, vector<128x384xf32>, vector<8x384xf32> -> vector<8x384xf32>
      %44 = vector.extract_strided_slice %38 {offsets = [0, 0], sizes = [8, 128], strides = [1, 1]} : vector<8x384xf32> to vector<8x128xf32>
      %45 = vector.extract_strided_slice %42 {offsets = [0, 0], sizes = [8, 128], strides = [1, 1]} : vector<8x384xf32> to vector<8x128xf32>
      %46 = arith.addf %44, %45 : vector<8x128xf32>
      %47 = arith.negf %46 : vector<8x128xf32>
      %48 = math.exp %47 : vector<8x128xf32>
      %cst_42 = arith.constant 1.000000e+00 : f32
      %49 = vector.broadcast %cst_42 : f32 to vector<8x128xf32>
      %50 = arith.addf %49, %48 : vector<8x128xf32>
      %51 = arith.divf %49, %50 : vector<8x128xf32>
      %52 = vector.extract_strided_slice %38 {offsets = [0, 128], sizes = [8, 128], strides = [1, 1]} : vector<8x384xf32> to vector<8x128xf32>
      %53 = vector.extract_strided_slice %42 {offsets = [0, 128], sizes = [8, 128], strides = [1, 1]} : vector<8x384xf32> to vector<8x128xf32>
      %54 = arith.addf %52, %53 : vector<8x128xf32>
      %55 = arith.negf %54 : vector<8x128xf32>
      %56 = math.exp %55 : vector<8x128xf32>
      %cst_43 = arith.constant 1.000000e+00 : f32
      %57 = vector.broadcast %cst_43 : f32 to vector<8x128xf32>
      %58 = arith.addf %57, %56 : vector<8x128xf32>
      %59 = arith.divf %57, %58 : vector<8x128xf32>
      %60 = vector.extract_strided_slice %38 {offsets = [0, 256], sizes = [8, 128], strides = [1, 1]} : vector<8x384xf32> to vector<8x128xf32>
      %61 = vector.extract_strided_slice %42 {offsets = [0, 256], sizes = [8, 128], strides = [1, 1]} : vector<8x384xf32> to vector<8x128xf32>
      %62 = arith.addf %61, %20 : vector<8x128xf32>
      %63 = arith.mulf %51, %62 : vector<8x128xf32>
      %64 = arith.addf %60, %63 : vector<8x128xf32>
      %65 = math.tanh %64 : vector<8x128xf32>
      %cst_44 = arith.constant 1.000000e+00 : f32
      %66 = vector.broadcast %cst_44 : f32 to vector<8x128xf32>
      %67 = arith.subf %66, %59 : vector<8x128xf32>
      %68 = arith.mulf %67, %65 : vector<8x128xf32>
      %69 = arith.mulf %59, %arg13 : vector<8x128xf32>
      %70 = arith.addf %68, %69 : vector<8x128xf32>
      %71 = vector.extract_strided_slice %41 {offsets = [0, 0], sizes = [8, 128], strides = [1, 1]} : vector<8x384xf32> to vector<8x128xf32>
      %72 = vector.extract_strided_slice %43 {offsets = [0, 0], sizes = [8, 128], strides = [1, 1]} : vector<8x384xf32> to vector<8x128xf32>
      %73 = arith.addf %71, %72 : vector<8x128xf32>
      %74 = arith.negf %73 : vector<8x128xf32>
      %75 = math.exp %74 : vector<8x128xf32>
      %cst_45 = arith.constant 1.000000e+00 : f32
      %76 = vector.broadcast %cst_45 : f32 to vector<8x128xf32>
      %77 = arith.addf %76, %75 : vector<8x128xf32>
      %78 = arith.divf %76, %77 : vector<8x128xf32>
      %79 = vector.extract_strided_slice %41 {offsets = [0, 128], sizes = [8, 128], strides = [1, 1]} : vector<8x384xf32> to vector<8x128xf32>
      %80 = vector.extract_strided_slice %43 {offsets = [0, 128], sizes = [8, 128], strides = [1, 1]} : vector<8x384xf32> to vector<8x128xf32>
      %81 = arith.addf %79, %80 : vector<8x128xf32>
      %82 = arith.negf %81 : vector<8x128xf32>
      %83 = math.exp %82 : vector<8x128xf32>
      %cst_46 = arith.constant 1.000000e+00 : f32
      %84 = vector.broadcast %cst_46 : f32 to vector<8x128xf32>
      %85 = arith.addf %84, %83 : vector<8x128xf32>
      %86 = arith.divf %84, %85 : vector<8x128xf32>
      %87 = vector.extract_strided_slice %41 {offsets = [0, 256], sizes = [8, 128], strides = [1, 1]} : vector<8x384xf32> to vector<8x128xf32>
      %88 = vector.extract_strided_slice %43 {offsets = [0, 256], sizes = [8, 128], strides = [1, 1]} : vector<8x384xf32> to vector<8x128xf32>
      %89 = arith.addf %88, %23 : vector<8x128xf32>
      %90 = arith.mulf %78, %89 : vector<8x128xf32>
      %91 = arith.addf %87, %90 : vector<8x128xf32>
      %92 = math.tanh %91 : vector<8x128xf32>
      %cst_47 = arith.constant 1.000000e+00 : f32
      %93 = vector.broadcast %cst_47 : f32 to vector<8x128xf32>
      %94 = arith.subf %93, %86 : vector<8x128xf32>
      %95 = arith.mulf %94, %92 : vector<8x128xf32>
      %96 = arith.mulf %86, %arg14 : vector<8x128xf32>
      %97 = arith.addf %95, %96 : vector<8x128xf32>
      %98 = vector.broadcast %arg12 : i32 to vector<8x1xi32>
      %99 = arith.cmpi slt, %98, %13 : vector<8x1xi32>
      %100 = vector.broadcast %35 : i32 to vector<8x1xi32>
      %101 = arith.cmpi slt, %100, %13 : vector<8x1xi32>
      %cst_48 = arith.constant 0.000000e+00 : f32
      %102 = vector.shape_cast %99 : vector<8x1xi1> to vector<8x1xi1>
      %103 = vector.broadcast %102 : vector<8x1xi1> to vector<8x128xi1>
      %104 = vector.broadcast %cst_48 : f32 to vector<8x128xf32>
      %105 = arith.select %103, %70, %104 : vector<8x128xi1>, vector<8x128xf32>
      %106 = arith.index_cast %arg12 : i32 to index
      %c0_49 = arith.constant 0 : index
      %c0_50 = arith.constant 0 : index
      %107 = vector.load %arg7[%106, %c0_49, %c0_50] : memref<8x8x128xf32, #tpu.memory_space<vmem>>, vector<1x8x128xf32>
      %108 = vector.shape_cast %107 : vector<1x8x128xf32> to vector<8x128xf32>
      %109 = vector.shape_cast %105 : vector<8x128xf32> to vector<1x8x128xf32>
      tpu.vector_store %arg7[%106, %c0_49, %c0_50], %109 {strides = array<i32>} : memref<8x8x128xf32, #tpu.memory_space<vmem>>, vector<1x8x128xf32>,
      %cst_51 = arith.constant 0.000000e+00 : f32
      %110 = vector.shape_cast %101 : vector<8x1xi1> to vector<8x1xi1>
      %111 = vector.broadcast %110 : vector<8x1xi1> to vector<8x128xi1>
      %112 = vector.broadcast %cst_51 : f32 to vector<8x128xf32>
      %113 = arith.select %111, %97, %112 : vector<8x128xi1>, vector<8x128xf32>
      %114 = arith.index_cast %35 : i32 to index
      %c0_52 = arith.constant 0 : index
      %c0_53 = arith.constant 0 : index
      %115 = vector.load %arg11[%114, %c0_52, %c0_53] : memref<8x8x128xf32, #tpu.memory_space<vmem>>, vector<1x8x128xf32>
      %116 = vector.shape_cast %115 : vector<1x8x128xf32> to vector<8x128xf32>
      %117 = vector.shape_cast %113 : vector<8x128xf32> to vector<1x8x128xf32>
      tpu.vector_store %arg11[%114, %c0_52, %c0_53], %117 {strides = array<i32>} : memref<8x8x128xf32, #tpu.memory_space<vmem>>, vector<1x8x128xf32>,
      %118 = vector.shape_cast %99 : vector<8x1xi1> to vector<8x1xi1>
      %119 = vector.broadcast %118 : vector<8x1xi1> to vector<8x128xi1>
      %120 = arith.select %119, %70, %arg13 : vector<8x128xi1>, vector<8x128xf32>
      %121 = vector.shape_cast %101 : vector<8x1xi1> to vector<8x1xi1>
      %122 = vector.broadcast %121 : vector<8x1xi1> to vector<8x128xi1>
      %123 = arith.select %122, %97, %arg14 : vector<8x128xi1>, vector<8x128xf32>
      scf.yield %120, %123 : vector<8x128xf32>, vector<8x128xf32>
    }
    %c8_i32_23 = arith.constant 8 : i32
    %c0_24 = arith.constant 0 : index
    %c0_25 = arith.constant 0 : index
    %c0_26 = arith.constant 0 : index
    %27 = vector.load %arg7[%c0_24, %c0_25, %c0_26] : memref<8x8x128xf32, #tpu.memory_space<vmem>>, vector<8x8x128xf32>
    %c0_27 = arith.constant 0 : index
    %c0_28 = arith.constant 0 : index
    %c0_29 = arith.constant 0 : index
    %28 = vector.load %arg11[%c0_27, %c0_28, %c0_29] : memref<8x8x128xf32, #tpu.memory_space<vmem>>, vector<8x8x128xf32>
    %29 = arith.addf %27, %28 : vector<8x8x128xf32>
    %c0_30 = arith.constant 0 : index
    %c0_31 = arith.constant 0 : index
    %c0_32 = arith.constant 0 : index
    %30 = vector.load %arg7[%c0_30, %c0_31, %c0_32] : memref<8x8x128xf32, #tpu.memory_space<vmem>>, vector<8x8x128xf32>
    tpu.vector_store %arg7[%c0_30, %c0_31, %c0_32], %29 {strides = array<i32>} : memref<8x8x128xf32, #tpu.memory_space<vmem>>, vector<8x8x128xf32>,
    %31 = arith.addf %26#0, %26#1 : vector<8x128xf32>
    %c0_33 = arith.constant 0 : index
    %c0_34 = arith.constant 0 : index
    %c0_35 = arith.constant 0 : index
    %32 = vector.load %arg8[%c0_33, %c0_34, %c0_35] : memref<1x8x128xf32, #tpu.memory_space<vmem>>, vector<1x8x128xf32>
    %33 = vector.shape_cast %32 : vector<1x8x128xf32> to vector<8x128xf32>
    %34 = vector.shape_cast %31 : vector<8x128xf32> to vector<1x8x128xf32>
    tpu.vector_store %arg8[%c0_33, %c0_34, %c0_35], %34 {strides = array<i32>} : memref<1x8x128xf32, #tpu.memory_space<vmem>>, vector<1x8x128xf32>,
    return
  }
  func.func @transform_0(%arg0: i32) -> (i32, i32, i32) {
    %c0_i32 = arith.constant 0 : i32
    %c0_i32_0 = arith.constant 0 : i32
    %c0_i32_1 = arith.constant 0 : i32
    return %c0_i32, %arg0, %c0_i32_0 : i32, i32, i32
  }
  func.func @transform_1(%arg0: i32) -> (i32, i32) {
    %c0_i32 = arith.constant 0 : i32
    %c0_i32_0 = arith.constant 0 : i32
    return %arg0, %c0_i32 : i32, i32
  }
  func.func @transform_2(%arg0: i32) -> (i32, i32) {
    %c0_i32 = arith.constant 0 : i32
    %c0_i32_0 = arith.constant 0 : i32
    %c0_i32_1 = arith.constant 0 : i32
    return %c0_i32, %c0_i32_0 : i32, i32
  }
  func.func @transform_3(%arg0: i32) -> (i32, i32, i32) {
    %c0_i32 = arith.constant 0 : i32
    %c0_i32_0 = arith.constant 0 : i32
    %c0_i32_1 = arith.constant 0 : i32
    %c0_i32_2 = arith.constant 0 : i32
    return %c0_i32, %c0_i32_0, %c0_i32_1 : i32, i32, i32
  }
  func.func @transform_4(%arg0: i32) -> (i32, i32) {
    %c0_i32 = arith.constant 0 : i32
    %c0_i32_0 = arith.constant 0 : i32
    %c0_i32_1 = arith.constant 0 : i32
    return %c0_i32, %c0_i32_0 : i32, i32
  }
  func.func @transform_5(%arg0: i32) -> (i32, i32) {
    %c0_i32 = arith.constant 0 : i32
    %c0_i32_0 = arith.constant 0 : i32
    %c0_i32_1 = arith.constant 0 : i32
    return %c0_i32, %c0_i32_0 : i32, i32
  }
  func.func @transform_6(%arg0: i32) -> (i32, i32, i32) {
    %c0_i32 = arith.constant 0 : i32
    %c0_i32_0 = arith.constant 0 : i32
    %c0_i32_1 = arith.constant 0 : i32
    return %c0_i32, %arg0, %c0_i32_0 : i32, i32, i32
  }
  func.func @transform_7(%arg0: i32) -> (i32, i32, i32) {
    %c0_i32 = arith.constant 0 : i32
    %c0_i32_0 = arith.constant 0 : i32
    %c0_i32_1 = arith.constant 0 : i32
    return %c0_i32, %arg0, %c0_i32_0 : i32, i32, i32
  }
}

</mosaic_0001>

<bundles_post_ra>
// kernel: gru_encoder_forward.1
= control target key start
LH: loop header
LB: loop body
LE: loop exit
PB: predicated region body
PF: predicated region fallthrough
CT: control target
= control target key end

     0   :  { %vm71_vm0 = vcmask 261120   ;;  %s1952_s2 = inlined_call_operand.vmem [shape: f32[32,768], index: 2, kind: input, shape index: {}]   ;;  %s1953_s6 = inlined_call_operand.vmem [shape: f32[8,8,128], index: 6, kind: output, shape index: {0}]   ;;  %s1954_s7 = inlined_call_operand.vmem [shape: f32[1,8,128], index: 7, kind: output, shape index: {1}]   ;;  %s1955_s0 = inlined_call_operand.vmem [shape: f32[8,8,32], index: 0, kind: input, shape index: {}]   ;;  %s1956_s5 = inlined_call_operand.vmem [shape: f32[1,256], index: 5, kind: input, shape index: {}]   ;;  %s1957_s4 = inlined_call_operand.vmem [shape: f32[1,768], index: 4, kind: input, shape index: {}]   ;;  %s1958_s1 = inlined_call_operand.vmem [shape: s32[8,1], index: 1, kind: input, shape index: {}]   ;;  %s1959_s3 = inlined_call_operand.vmem [shape: f32[2,128,384], index: 3, kind: input, shape index: {}]  }
   0x1   :  { %v51_v0 = vld [vmem:[%s1952_s2 + $0x90] sm:$0xff]  ;;  %v52_v1 = vld [vmem:[%s1952_s2 + $0x98] sm:$0xff]  ;;  %v45_v2 = vld [vmem:[%s1952_s2 + $0x60] sm:$0xff] }
   0x2   :  { %924 = vmatpush.msra.mxu2 %v51_v0  ;;  %928 = vmatpush.msra.mxu3 %v52_v1  ;;  %v46_v3 = vld [vmem:[%s1952_s2 + $0x68] sm:$0xff]  ;;  %v39_v4 = vld [vmem:[%s1952_s2 + $0x30] sm:$0xff]  ;;  %v40_v5 = vld [vmem:[%s1952_s2 + $0x38] sm:$0xff] }
   0x3   :  { %108 = vmatpush.msra.mxu0 %v51_v0  ;;  %149 = vmatpush.msra.mxu1 %v52_v1  ;;  %v33_v6 = vld [vmem:[%s1952_s2] sm:$0xff]  ;;  %v34_v7 = vld [vmem:[%s1952_s2 + $0x8] sm:$0xff]  ;;  %v55_v12 = vld [vmem:[%s1952_s2 + $0xb0] sm:$0xff] }
   0x4   :  { %925 = vmatpush.msra.mxu2 %v45_v2  ;;  %929 = vmatpush.msra.mxu3 %v46_v3  ;;  %v1072_v8 = vld [vmem:[%s1955_s0 + $0x20] sm:$0xff]  ;;  %v54_v10 = vld [vmem:[%s1952_s2 + $0xa8] sm:$0xff]  ;;  %v56_v13 = vld [vmem:[%s1952_s2 + $0xb8] sm:$0xff] }
   0x5   :  { %109 = vmatpush.msra.mxu0 %v45_v2  ;;  %150 = vmatpush.msra.mxu1 %v46_v3  ;;  %v53_v9 = vld [vmem:[%s1952_s2 + $0xa0] sm:$0xff]  ;;  %v47_v14 = vld [vmem:[%s1952_s2 + $0x70] sm:$0xff]  ;;  %v48_v15 = vld [vmem:[%s1952_s2 + $0x78] sm:$0xff] }
   0x6   :  { %926 = vmatpush.msra.mxu2 %v39_v4  ;;  %930 = vmatpush.msra.mxu3 %v40_v5  ;;  %v25_v11 = vld [vmem:[%s1955_s0] sm:$0xff]  ;;  %v50_v17 = vld [vmem:[%s1952_s2 + $0x88] sm:$0xff]  ;;  %v43_v21 = vld [vmem:[%s1952_s2 + $0x50] sm:$0xff] }
   0x7   :  { %110 = vmatpush.msra.mxu0 %v39_v4  ;;  %151 = vmatpush.msra.mxu1 %v40_v5  ;;  %v49_v16 = vld [vmem:[%s1952_s2 + $0x80] sm:$0xff]  ;;  %v42_v19 = vld [vmem:[%s1952_s2 + $0x48] sm:$0xff]  ;;  %v44_v22 = vld [vmem:[%s1952_s2 + $0x58] sm:$0xff] }
   0x8   :  { %927 = vmatpush.msra.mxu2 %v33_v6  ;;  %931 = vmatpush.msra.mxu3 %v34_v7  ;;  %v41_v18 = vld [vmem:[%s1952_s2 + $0x40] sm:$0xff]  ;;  %v30_v20 = vld [vmem:[%s1955_s0 + $0x28] sm:$0xff]  ;;  %v35_v23 = vld [vmem:[%s1952_s2 + $0x10] sm:$0xff] }
   0x9   :  { %822 = vmatmul.msk.f32.vlgmr.msra.gmra.mxu2 %vm71_vm0, %v1072_v8  ;;  %830 = vmatmul.msk.f32.vlgmr.msra.gmra.mxu3 %vm71_vm0, %v1072_v8  ;;  %v36_v24 = vld [vmem:[%s1952_s2 + $0x18] sm:$0xff]  ;;  %v26_v25 = vld [vmem:[%s1955_s0 + $0x8] sm:$0xff]  ;;  %v37_v26 = vld [vmem:[%s1952_s2 + $0x20] sm:$0xff] }
   0xa   :  { %190 = vmatpush.msrb.mxu2 %v53_v9  ;;  %231 = vmatpush.msrb.mxu3 %v54_v10  ;;  %v38_v27 = vld [vmem:[%s1952_s2 + $0x28] sm:$0xff]  ;;  %v31_v28 = vld [vmem:[%s1955_s0 + $0x30] sm:$0xff]  ;;  %v32_v30 = vld [vmem:[%s1955_s0 + $0x38] sm:$0xff] }
   0xb   :  { %111 = vmatpush.msra.mxu0 %v33_v6  ;;  %152 = vmatpush.msra.mxu1 %v34_v7  ;;  %v27_v29 = vld [vmem:[%s1955_s0 + $0x10] sm:$0xff]  ;;  %v28_v31 = vld [vmem:[%s1955_s0 + $0x18] sm:$0xff]  ;;  %v57_v32 = vld [vmem:[%s1957_s4] sm:$0x3f] }
   0xc   :  { %818 = vmatmul.msk.f32.vlgmr.msra.gmra.mxu0 %vm71_vm0, %v25_v11  ;;  %826 = vmatmul.msk.f32.vlgmr.msra.gmra.mxu1 %vm71_vm0, %v25_v11  ;;  %v59_v33 = vperm.slane %v57_v32, 0  ;;  %v60_v34 = vperm.slane %v57_v32, 1  ;;  %v1200_v3 = vperm.slane %v57_v32, 4  ;;  %v1202_v4 = vperm.slane %v57_v32, 5 }
   0xd   :  { %272 = vmatpush.msrb.mxu0 %v55_v12  ;;  %313 = vmatpush.msrb.mxu1 %v56_v13  ;;  %v1204_v5 = vperm.slane %v57_v32, 2  ;;  %v1206_v6 = vperm.slane %v57_v32, 3 }
   0xe   :  { %191 = vmatpush.msrb.mxu2 %v47_v14  ;;  %232 = vmatpush.msrb.mxu3 %v48_v15 }
   0xf   :  { %273 = vmatpush.msrb.mxu0 %v49_v16  ;;  %314 = vmatpush.msrb.mxu1 %v50_v17 }
  0x10   :  { %192 = vmatpush.msrb.mxu2 %v41_v18  ;;  %233 = vmatpush.msrb.mxu3 %v42_v19 }
  0x11   :  { %823 = vmatmul.msk.f32.gmra.mxu2 %vm71_vm0, %v30_v20  ;;  %831 = vmatmul.msk.f32.gmra.mxu3 %vm71_vm0, %v30_v20 }
  0x12   :  { %274 = vmatpush.msrb.mxu0 %v43_v21  ;;  %315 = vmatpush.msrb.mxu1 %v44_v22 }
  0x13   :  { %193 = vmatpush.msrb.mxu2 %v35_v23  ;;  %234 = vmatpush.msrb.mxu3 %v36_v24 }
  0x14   :  { %819 = vmatmul.msk.f32.gmra.mxu0 %vm71_vm0, %v26_v25  ;;  %827 = vmatmul.msk.f32.gmra.mxu1 %vm71_vm0, %v26_v25 }
  0x15   :  { %275 = vmatpush.msrb.mxu0 %v37_v26  ;;  %316 = vmatpush.msrb.mxu1 %v38_v27 }
  0x19   :  { %824 = vmatmul.msk.f32.gmra.mxu2 %vm71_vm0, %v31_v28  ;;  %832 = vmatmul.msk.f32.gmra.mxu3 %vm71_vm0, %v31_v28 }
  0x1c   :  { %820 = vmatmul.msk.f32.gmra.mxu0 %vm71_vm0, %v27_v29  ;;  %828 = vmatmul.msk.f32.gmra.mxu1 %vm71_vm0, %v27_v29 }
  0x21   :  { %825 = vmatmul.msk.f32.gmra.mxu2 %vm71_vm0, %v32_v30  ;;  %833 = vmatmul.msk.f32.gmra.mxu3 %vm71_vm0, %v32_v30 }
  0x24   :  { %821 = vmatmul.msk.f32.gmra.mxu0 %vm71_vm0, %v28_v31  ;;  %829 = vmatmul.msk.f32.gmra.mxu1 %vm71_vm0, %v28_v31 }
  0x29   :  { %834 = vmatmul.msk.f32.vlgmr.msrb.gmra.mxu2 %vm71_vm0, %v25_v11  ;;  %842 = vmatmul.msk.f32.vlgmr.msrb.gmra.mxu3 %vm71_vm0, %v25_v11 }
  0x2c   :  { %850 = vmatmul.msk.f32.vlgmr.msrb.gmra.mxu0 %vm71_vm0, %v25_v11  ;;  %858 = vmatmul.msk.f32.vlgmr.msrb.gmra.mxu1 %vm71_vm0, %v25_v11 }
  0x31   :  { %835 = vmatmul.msk.f32.gmra.mxu2 %vm71_vm0, %v26_v25  ;;  %843 = vmatmul.msk.f32.gmra.mxu3 %vm71_vm0, %v26_v25 }
  0x34   :  { %851 = vmatmul.msk.f32.gmra.mxu0 %vm71_vm0, %v26_v25  ;;  %859 = vmatmul.msk.f32.gmra.mxu1 %vm71_vm0, %v26_v25 }
  0x39   :  { %836 = vmatmul.msk.f32.gmra.mxu2 %vm71_vm0, %v27_v29  ;;  %844 = vmatmul.msk.f32.gmra.mxu3 %vm71_vm0, %v27_v29 }
  0x3c   :  { %852 = vmatmul.msk.f32.gmra.mxu0 %vm71_vm0, %v27_v29  ;;  %860 = vmatmul.msk.f32.gmra.mxu1 %vm71_vm0, %v27_v29 }
  0x41   :  { %837 = vmatmul.msk.f32.gmra.mxu2 %vm71_vm0, %v28_v31  ;;  %845 = vmatmul.msk.f32.gmra.mxu3 %vm71_vm0, %v28_v31 }
  0x44   :  { %853 = vmatmul.msk.f32.gmra.mxu0 %vm71_vm0, %v28_v31  ;;  %861 = vmatmul.msk.f32.gmra.mxu1 %vm71_vm0, %v28_v31 }
  0x49   :  { %838 = vmatmul.msk.f32.gmra.mxu2 %vm71_vm0, %v1072_v8  ;;  %846 = vmatmul.msk.f32.gmra.mxu3 %vm71_vm0, %v1072_v8 }
  0x4c   :  { %854 = vmatmul.msk.f32.gmra.mxu0 %vm71_vm0, %v1072_v8  ;;  %862 = vmatmul.msk.f32.gmra.mxu1 %vm71_vm0, %v1072_v8 }
  0x51   :  { %839 = vmatmul.msk.f32.gmra.mxu2 %vm71_vm0, %v30_v20  ;;  %847 = vmatmul.msk.f32.gmra.mxu3 %vm71_vm0, %v30_v20 }
  0x54   :  { %855 = vmatmul.msk.f32.gmra.mxu0 %vm71_vm0, %v30_v20  ;;  %863 = vmatmul.msk.f32.gmra.mxu1 %vm71_vm0, %v30_v20 }
  0x59   :  { %840 = vmatmul.msk.f32.gmra.mxu2 %vm71_vm0, %v31_v28  ;;  %848 = vmatmul.msk.f32.gmra.mxu3 %vm71_vm0, %v31_v28 }
  0x5c   :  { %856 = vmatmul.msk.f32.gmra.mxu0 %vm71_vm0, %v31_v28  ;;  %864 = vmatmul.msk.f32.gmra.mxu1 %vm71_vm0, %v31_v28 }
  0x61   :  { %841 = vmatmul.msk.f32.gmra.mxu2 %vm71_vm0, %v32_v30  ;;  %849 = vmatmul.msk.f32.gmra.mxu3 %vm71_vm0, %v32_v30 }
  0x64   :  { %857 = vmatmul.msk.f32.gmra.mxu0 %vm71_vm0, %v32_v30  ;;  %865 = vmatmul.msk.f32.gmra.mxu1 %vm71_vm0, %v32_v30 }
  0x89   :  { %v113_v35 = vpop.f32.mrf.mxu0  ;;  %v154_v36 = vpop.f32.mrf.mxu1 }
  0x8a   :  { %v114_v37 = vadd.f32 %v113_v35, %v59_v33  ;;  %v155_v38 = vadd.f32 %v154_v36, %v60_v34 }
  0x8c   :  { %342 = vst [vmem:[#allocation2] sm:$0xff] %v114_v37  ;;  %v125_v39 = vpop.f32.mrf.mxu2  ;;  %v166_v40 = vpop.f32.mrf.mxu3 }
  0x8d   :  { %v126_v41 = vadd.f32 %v125_v39, %v59_v33  ;;  %343 = vst [vmem:[#allocation2 + $0x8] sm:$0xff] %v155_v38  ;;  %v167_v42 = vadd.f32 %v166_v40, %v60_v34  ;;  %v1227_v39 = vld [vmem:[%s1958_s1] sm:$0xff]  ;;  %s1739_s1 = smov 0  }
  0x8e   :  { %1962 = vst [vmem:[#allocation5_spill] sm:$0xff] %v1227_v39  ;;  %v1232_v40 = vld [vmem:[%s1959_s3] sm:$0xff] }
  0x8f   :  { %354 = vst [vmem:[#allocation2 + $0x60] sm:$0xff] %v126_v41  ;;  %v1237_v41 = vld [vmem:[%s1959_s3 + $0x8] sm:$0xff] }
  0x90   :  { %355 = vst [vmem:[#allocation2 + $0x68] sm:$0xff] %v167_v42 }
  0x91   :  { %v116_v43 = vpop.f32.mrf.mxu0  ;;  %v157_v44 = vpop.f32.mrf.mxu1  ;;  %1963 = vst [vmem:[#allocation6_spill] sm:$0xff] %v1232_v40 }
  0x92   :  { %v117_v45 = vadd.f32 %v116_v43, %v59_v33  ;;  %v158_v46 = vadd.f32 %v157_v44, %v60_v34  ;;  %1964 = vst [vmem:[#allocation7_spill] sm:$0xff] %v1237_v41  ;;  %v1242_v44 = vld [vmem:[%s1959_s3 + $0x10] sm:$0xff]  ;;  %v1564_v41 = vld [vmem:[%s1959_s3 + $0x200] sm:$0xff] }
  0x93   :  { %1965 = vst [vmem:[#allocation8_spill] sm:$0xff] %v1242_v44  ;;  %v1547_v44 = vld [vmem:[%s1959_s3 + $0x1e8] sm:$0xff] }
  0x94   :  { %345 = vst [vmem:[#allocation2 + $0x18] sm:$0xff] %v117_v45  ;;  %v128_v47 = vpop.f32.mrf.mxu2  ;;  %v169_v48 = vpop.f32.mrf.mxu3  ;;  %v1247_v45 = vld [vmem:[%s1959_s3 + $0x18] sm:$0xff] }
  0x95   :  { %v129_v49 = vadd.f32 %v128_v47, %v59_v33  ;;  %346 = vst [vmem:[#allocation2 + $0x20] sm:$0xff] %v158_v46  ;;  %v170_v50 = vadd.f32 %v169_v48, %v60_v34  ;;  %v1252_v46 = vld [vmem:[%s1959_s3 + $0x20] sm:$0xff] }
  0x96   :  { %1966 = vst [vmem:[#allocation9_spill] sm:$0xff] %v1247_v45  ;;  %v1688_v45 = vld [vmem:[%s1959_s3 + $0x2c0] sm:$0xff] }
  0x97   :  { %357 = vst [vmem:[#allocation2 + $0x78] sm:$0xff] %v129_v49  ;;  %v1259_v49 = vld [vmem:[%s1959_s3 + $0x28] sm:$0xff] }
  0x98   :  { %358 = vst [vmem:[#allocation2 + $0x80] sm:$0xff] %v170_v50  ;;  %v1264_v50 = vld [vmem:[%s1959_s3 + $0x30] sm:$0xff] }
  0x99   :  { %v119_v51 = vpop.f32.mrf.mxu0  ;;  %v160_v52 = vpop.f32.mrf.mxu1  ;;  %1967 = vst [vmem:[#allocation10_spill] sm:$0xff] %v1252_v46  ;;  %v1641_v46 = vld [vmem:[%s1959_s3 + $0x278] sm:$0xff] }
  0x9a   :  { %v120_v53 = vadd.f32 %v119_v51, %v59_v33  ;;  %v161_v54 = vadd.f32 %v160_v52, %v60_v34  ;;  %1968 = vst [vmem:[#allocation11_spill] sm:$0xff] %v1259_v49  ;;  %v1269_v51 = vld [vmem:[%s1959_s3 + $0x38] sm:$0xff]  ;;  %v1274_v52 = vld [vmem:[%s1959_s3 + $0x40] sm:$0xff]  ;;  %v1631_v49 = vld [vmem:[%s1959_s3 + $0x268] sm:$0xff] }
  0x9b   :  { %1999 = vst [vmem:[#allocation42_spill] sm:$0xff] %v1547_v44  ;;  %v1594_v44 = vld [vmem:[%s1959_s3 + $0x230] sm:$0xff] }
  0x9c   :  { %348 = vst [vmem:[#allocation2 + $0x30] sm:$0xff] %v120_v53  ;;  %v131_v55 = vpop.f32.mrf.mxu2  ;;  %v172_v56 = vpop.f32.mrf.mxu3  ;;  %v1279_v53 = vld [vmem:[%s1959_s3 + $0x48] sm:$0xff] }
  0x9d   :  { %v132_v57 = vadd.f32 %v131_v55, %v59_v33  ;;  %349 = vst [vmem:[#allocation2 + $0x38] sm:$0xff] %v161_v54  ;;  %v173_v58 = vadd.f32 %v172_v56, %v60_v34  ;;  %v1284_v54 = vld [vmem:[%s1959_s3 + $0x50] sm:$0xff] }
  0x9e   :  { %2002 = vst [vmem:[#allocation45_spill] sm:$0xff] %v1564_v41  ;;  %v1609_v41 = vld [vmem:[%s1959_s3 + $0x248] sm:$0xff] }
  0x9f   :  { %360 = vst [vmem:[#allocation2 + $0x90] sm:$0xff] %v132_v57  ;;  %v1289_v57 = vld [vmem:[%s1959_s3 + $0x58] sm:$0xff] }
  0xa0   :  { %361 = vst [vmem:[#allocation2 + $0x98] sm:$0xff] %v173_v58  ;;  %v1294_v58 = vld [vmem:[%s1959_s3 + $0x60] sm:$0xff] }
  0xa1   :  { %v122_v59 = vpop.f32.mrf.mxu0  ;;  %v163_v60 = vpop.f32.mrf.mxu1  ;;  %2007 = vst [vmem:[#allocation50_spill] sm:$0xff] %v1594_v44  ;;  %v1624_v44 = vld [vmem:[%s1959_s3 + $0x260] sm:$0xff] }
  0xa2   :  { %v123_v61 = vadd.f32 %v122_v59, %v59_v33  ;;  %v164_v62 = vadd.f32 %v163_v60, %v60_v34  ;;  %v1299_v59 = vld [vmem:[%s1959_s3 + $0x68] sm:$0xff]  ;;  %2009 = vst [vmem:[#allocation52_spill] sm:$0xff] %v1609_v41 }
  0xa3   :  { %2011 = vst [vmem:[#allocation54_spill] sm:$0xff] %v1624_v44  ;;  %v1661_v44 = vld [vmem:[%s1959_s3 + $0x298] sm:$0xff] }
  0xa4   :  { %351 = vst [vmem:[#allocation2 + $0x48] sm:$0xff] %v123_v61  ;;  %v134_v63 = vpop.f32.mrf.mxu2  ;;  %v175_v0 = vpop.f32.mrf.mxu3 }
  0xa5   :  { %v135_v1 = vadd.f32 %v134_v63, %v59_v33  ;;  %352 = vst [vmem:[#allocation2 + $0x50] sm:$0xff] %v164_v62  ;;  %v176_v2 = vadd.f32 %v175_v0, %v60_v34  ;;  %v1306_v62 = vld [vmem:[%s1959_s3 + $0x70] sm:$0xff]  ;;  %v1311_v63 = vld [vmem:[%s1959_s3 + $0x78] sm:$0xff]  ;;  %v1316_v0 = vld [vmem:[%s1959_s3 + $0x80] sm:$0xff] }
  0xa6   :  { %1969 = vst [vmem:[#allocation12_spill] sm:$0xff] %v1316_v0 }
  0xa7   :  { %363 = vst [vmem:[#allocation2 + $0xa8] sm:$0xff] %v135_v1  ;;  %v1321_v1 = vld [vmem:[%s1959_s3 + $0x88] sm:$0xff] }
  0xa8   :  { %364 = vst [vmem:[#allocation2 + $0xb0] sm:$0xff] %v176_v2  ;;  %v1326_v2 = vld [vmem:[%s1959_s3 + $0x90] sm:$0xff] }
  0xa9   :  { %v277_v7 = vpop.f32.mrf.mxu0  ;;  %v318_v8 = vpop.f32.mrf.mxu1  ;;  %1970 = vst [vmem:[#allocation13_spill] sm:$0xff] %v1321_v1 }
  0xaa   :  { %v278_v9 = vadd.f32 %v277_v7, %v1200_v3  ;;  %v319_v10 = vadd.f32 %v318_v8, %v1202_v4  ;;  %1971 = vst [vmem:[#allocation14_spill] sm:$0xff] %v1326_v2  ;;  %v1331_v7 = vld [vmem:[%s1959_s3 + $0x98] sm:$0xff]  ;;  %v1336_v8 = vld [vmem:[%s1959_s3 + $0xa0] sm:$0xff] }
  0xab   :  { %1972 = vst [vmem:[#allocation15_spill] sm:$0xff] %v1331_v7 }
  0xac   :  { %v195_v11 = vpop.f32.mrf.mxu2  ;;  %v236_v12 = vpop.f32.mrf.mxu3  ;;  %367 = vst [vmem:[#allocation3 + $0x8] sm:$0xff] %v278_v9  ;;  %v1341_v9 = vld [vmem:[%s1959_s3 + $0xa8] sm:$0xff] }
  0xad   :  { %v196_v13 = vadd.f32 %v195_v11, %v1204_v5  ;;  %v237_v14 = vadd.f32 %v236_v12, %v1206_v6  ;;  %368 = vst [vmem:[#allocation3 + $0x10] sm:$0xff] %v319_v10  ;;  %v1346_v10 = vld [vmem:[%s1959_s3 + $0xb0] sm:$0xff]  ;;  %v1351_v11 = vld [vmem:[%s1959_s3 + $0xb8] sm:$0xff]  ;;  %v1356_v12 = vld [vmem:[%s1959_s3 + $0xc0] sm:$0xff] }
  0xae   :  { %1973 = vst [vmem:[#allocation16_spill] sm:$0xff] %v1336_v8 }
  0xaf   :  { %344 = vst [vmem:[#allocation2 + $0x10] sm:$0xff] %v196_v13  ;;  %v1361_v13 = vld [vmem:[%s1959_s3 + $0xc8] sm:$0xff] }
  0xb0   :  { %366 = vst [vmem:[#allocation3] sm:$0xff] %v237_v14 }
  0xb1   :  { %v280_v15 = vpop.f32.mrf.mxu0  ;;  %v321_v16 = vpop.f32.mrf.mxu1  ;;  %1974 = vst [vmem:[#allocation17_spill] sm:$0xff] %v1341_v9 }
  0xb2   :  { %v281_v17 = vadd.f32 %v280_v15, %v1200_v3  ;;  %v322_v18 = vadd.f32 %v321_v16, %v1202_v4  ;;  %1975 = vst [vmem:[#allocation18_spill] sm:$0xff] %v1346_v10  ;;  %v1366_v16 = vld [vmem:[%s1959_s3 + $0xd0] sm:$0xff] }
  0xb3   :  { %1976 = vst [vmem:[#allocation19_spill] sm:$0xff] %v1351_v11 }
  0xb4   :  { %v198_v19 = vpop.f32.mrf.mxu2  ;;  %v239_v20 = vpop.f32.mrf.mxu3  ;;  %370 = vst [vmem:[#allocation3 + $0x20] sm:$0xff] %v281_v17  ;;  %v1371_v17 = vld [vmem:[%s1959_s3 + $0xd8] sm:$0xff] }
  0xb5   :  { %v199_v21 = vadd.f32 %v198_v19, %v1204_v5  ;;  %v240_v22 = vadd.f32 %v239_v20, %v1206_v6  ;;  %371 = vst [vmem:[#allocation3 + $0x28] sm:$0xff] %v322_v18  ;;  %v1376_v18 = vld [vmem:[%s1959_s3 + $0xe0] sm:$0xff] }
  0xb6   :  { %1977 = vst [vmem:[#allocation20_spill] sm:$0xff] %v1356_v12 }
  0xb7   :  { %347 = vst [vmem:[#allocation2 + $0x28] sm:$0xff] %v199_v21  ;;  %v1383_v21 = vld [vmem:[%s1959_s3 + $0xe8] sm:$0xff] }
  0xb8   :  { %369 = vst [vmem:[#allocation3 + $0x18] sm:$0xff] %v240_v22  ;;  %v1388_v22 = vld [vmem:[%s1959_s3 + $0xf0] sm:$0xff] }
  0xb9   :  { %v283_v23 = vpop.f32.mrf.mxu0  ;;  %v324_v24 = vpop.f32.mrf.mxu1  ;;  %1978 = vst [vmem:[#allocation21_spill] sm:$0xff] %v1361_v13 }
  0xba   :  { %v284_v25 = vadd.f32 %v283_v23, %v1200_v3  ;;  %v325_v26 = vadd.f32 %v324_v24, %v1202_v4  ;;  %1979 = vst [vmem:[#allocation22_spill] sm:$0xff] %v1366_v16  ;;  %v1393_v23 = vld [vmem:[%s1959_s3 + $0xf8] sm:$0xff]  ;;  %v1398_v24 = vld [vmem:[%s1959_s3 + $0x100] sm:$0xff] }
  0xbb   :  { %1980 = vst [vmem:[#allocation23_spill] sm:$0xff] %v1371_v17 }
  0xbc   :  { %v201_v27 = vpop.f32.mrf.mxu2  ;;  %v242_v28 = vpop.f32.mrf.mxu3  ;;  %373 = vst [vmem:[#allocation3 + $0x38] sm:$0xff] %v284_v25  ;;  %v1403_v25 = vld [vmem:[%s1959_s3 + $0x108] sm:$0xff] }
  0xbd   :  { %v202_v29 = vadd.f32 %v201_v27, %v1204_v5  ;;  %v243_v30 = vadd.f32 %v242_v28, %v1206_v6  ;;  %374 = vst [vmem:[#allocation3 + $0x40] sm:$0xff] %v325_v26  ;;  %v1408_v26 = vld [vmem:[%s1959_s3 + $0x110] sm:$0xff] }
  0xbe   :  { %1981 = vst [vmem:[#allocation24_spill] sm:$0xff] %v1376_v18 }
  0xbf   :  { %350 = vst [vmem:[#allocation2 + $0x40] sm:$0xff] %v202_v29  ;;  %v1413_v29 = vld [vmem:[%s1959_s3 + $0x118] sm:$0xff] }
  0xc0   :  { %372 = vst [vmem:[#allocation3 + $0x30] sm:$0xff] %v243_v30  ;;  %v1418_v30 = vld [vmem:[%s1959_s3 + $0x120] sm:$0xff] }
  0xc1   :  { %v286_v31 = vpop.f32.mrf.mxu0  ;;  %v327_v32 = vpop.f32.mrf.mxu1  ;;  %1982 = vst [vmem:[#allocation25_spill] sm:$0xff] %v1383_v21 }
  0xc2   :  { %v287_v33 = vadd.f32 %v286_v31, %v1200_v3  ;;  %v328_v34 = vadd.f32 %v327_v32, %v1202_v4  ;;  %1983 = vst [vmem:[#allocation26_spill] sm:$0xff] %v1388_v22  ;;  %v1423_v31 = vld [vmem:[%s1959_s3 + $0x128] sm:$0xff] }
  0xc3   :  { %1984 = vst [vmem:[#allocation27_spill] sm:$0xff] %v1393_v23 }
  0xc4   :  { %v204_v35 = vpop.f32.mrf.mxu2  ;;  %v245_v36 = vpop.f32.mrf.mxu3  ;;  %376 = vst [vmem:[#allocation3 + $0x50] sm:$0xff] %v287_v33 }
  0xc5   :  { %v205_v37 = vadd.f32 %v204_v35, %v1204_v5  ;;  %v246_v38 = vadd.f32 %v245_v36, %v1206_v6  ;;  %377 = vst [vmem:[#allocation3 + $0x58] sm:$0xff] %v328_v34  ;;  %v1430_v34 = vld [vmem:[%s1959_s3 + $0x130] sm:$0xff]  ;;  %v1435_v35 = vld [vmem:[%s1959_s3 + $0x138] sm:$0xff]  ;;  %v1440_v36 = vld [vmem:[%s1959_s3 + $0x140] sm:$0xff] }
  0xc6   :  { %1985 = vst [vmem:[#allocation28_spill] sm:$0xff] %v1398_v24 }
  0xc7   :  { %353 = vst [vmem:[#allocation2 + $0x58] sm:$0xff] %v205_v37  ;;  %v1445_v37 = vld [vmem:[%s1959_s3 + $0x148] sm:$0xff] }
  0xc8   :  { %375 = vst [vmem:[#allocation3 + $0x48] sm:$0xff] %v246_v38  ;;  %v1450_v38 = vld [vmem:[%s1959_s3 + $0x150] sm:$0xff] }
  0xc9   :  { %v289_v42 = vpop.f32.mrf.mxu0  ;;  %v330_v43 = vpop.f32.mrf.mxu1  ;;  %1986 = vst [vmem:[#allocation29_spill] sm:$0xff] %v1403_v25 }
  0xca   :  { %v290_v47 = vadd.f32 %v289_v42, %v1200_v3  ;;  %v331_v48 = vadd.f32 %v330_v43, %v1202_v4  ;;  %1987 = vst [vmem:[#allocation30_spill] sm:$0xff] %v1408_v26  ;;  %v1455_v42 = vld [vmem:[%s1959_s3 + $0x158] sm:$0xff]  ;;  %v1460_v43 = vld [vmem:[%s1959_s3 + $0x160] sm:$0xff] }
  0xcb   :  { %2012 = vst [vmem:[#allocation55_spill] sm:$0xff] %v1631_v49 }
  0xcc   :  { %v207_v55 = vpop.f32.mrf.mxu2  ;;  %v248_v56 = vpop.f32.mrf.mxu3  ;;  %379 = vst [vmem:[#allocation3 + $0x68] sm:$0xff] %v290_v47  ;;  %v1465_v47 = vld [vmem:[%s1959_s3 + $0x168] sm:$0xff] }
  0xcd   :  { %v208_v60 = vadd.f32 %v207_v55, %v1204_v5  ;;  %v249_v61 = vadd.f32 %v248_v56, %v1206_v6  ;;  %380 = vst [vmem:[#allocation3 + $0x70] sm:$0xff] %v331_v48  ;;  %v1470_v48 = vld [vmem:[%s1959_s3 + $0x170] sm:$0xff]  ;;  %v1475_v55 = vld [vmem:[%s1959_s3 + $0x178] sm:$0xff]  ;;  %v1480_v56 = vld [vmem:[%s1959_s3 + $0x180] sm:$0xff] }
  0xce   :  { %1988 = vst [vmem:[#allocation31_spill] sm:$0xff] %v1480_v56 }
  0xcf   :  { %356 = vst [vmem:[#allocation2 + $0x70] sm:$0xff] %v208_v60  ;;  %v1485_v60 = vld [vmem:[%s1959_s3 + $0x188] sm:$0xff] }
  0xd0   :  { %378 = vst [vmem:[#allocation3 + $0x60] sm:$0xff] %v249_v61 }
  0xd1   :  { %v292_v14 = vpop.f32.mrf.mxu0  ;;  %v333_v15 = vpop.f32.mrf.mxu1  ;;  %1989 = vst [vmem:[#allocation32_spill] sm:$0xff] %v1485_v60 }
  0xd2   :  { %v293_v19 = vadd.f32 %v292_v14, %v1200_v3  ;;  %v334_v20 = vadd.f32 %v333_v15, %v1202_v4  ;;  %v1490_v15 = vld [vmem:[%s1959_s3 + $0x190] sm:$0xff]  ;;  %2013 = vst [vmem:[#allocation56_spill] sm:$0xff] %v1641_v46  ;;  %v1671_v46 = vld [vmem:[%s1959_s3 + $0x2a8] sm:$0xff] }
  0xd3   :  { %1990 = vst [vmem:[#allocation33_spill] sm:$0xff] %v1490_v15  ;;  %v1517_v15 = vld [vmem:[%s1959_s3 + $0x1b8] sm:$0xff] }
  0xd4   :  { %v210_v27 = vpop.f32.mrf.mxu2  ;;  %v251_v28 = vpop.f32.mrf.mxu3  ;;  %382 = vst [vmem:[#allocation3 + $0x80] sm:$0xff] %v293_v19  ;;  %v1495_v19 = vld [vmem:[%s1959_s3 + $0x198] sm:$0xff] }
  0xd5   :  { %v211_v32 = vadd.f32 %v210_v27, %v1204_v5  ;;  %v252_v33 = vadd.f32 %v251_v28, %v1206_v6  ;;  %383 = vst [vmem:[#allocation3 + $0x88] sm:$0xff] %v334_v20  ;;  %v1500_v20 = vld [vmem:[%s1959_s3 + $0x1a0] sm:$0xff] }
  0xd6   :  { %1991 = vst [vmem:[#allocation34_spill] sm:$0xff] %v1495_v19 }
  0xd7   :  { %359 = vst [vmem:[#allocation2 + $0x88] sm:$0xff] %v211_v32  ;;  %v1507_v32 = vld [vmem:[%s1959_s3 + $0x1a8] sm:$0xff] }
  0xd8   :  { %381 = vst [vmem:[#allocation3 + $0x78] sm:$0xff] %v252_v33  ;;  %v1512_v33 = vld [vmem:[%s1959_s3 + $0x1b0] sm:$0xff] }
  0xd9   :  { %v295_v61 = vpop.f32.mrf.mxu0  ;;  %v336_v14 = vpop.f32.mrf.mxu1  ;;  %1992 = vst [vmem:[#allocation35_spill] sm:$0xff] %v1500_v20 }
  0xda   :  { %v296_v27 = vadd.f32 %v295_v61, %v1200_v3  ;;  %v337_v28 = vadd.f32 %v336_v14, %v1202_v4  ;;  %1993 = vst [vmem:[#allocation36_spill] sm:$0xff] %v1507_v32  ;;  %v1522_v61 = vld [vmem:[%s1959_s3 + $0x1c0] sm:$0xff]  ;;  %v1527_v14 = vld [vmem:[%s1959_s3 + $0x1c8] sm:$0xff]  ;;  %v1532_v32 = vld [vmem:[%s1959_s3 + $0x1d0] sm:$0xff] }
  0xdb   :  { %1994 = vst [vmem:[#allocation37_spill] sm:$0xff] %v1517_v15  ;;  %v1537_v15 = vld [vmem:[%s1959_s3 + $0x1d8] sm:$0xff] }
  0xdc   :  { %1995 = vst [vmem:[#allocation38_spill] sm:$0xff] %v1522_v61  ;;  %v213_v60 = vpop.f32.mrf.mxu2  ;;  %v254_v20 = vpop.f32.mrf.mxu3  ;;  %v1542_v61 = vld [vmem:[%s1959_s3 + $0x1e0] sm:$0xff] }
  0xdd   :  { %1996 = vst [vmem:[#allocation39_spill] sm:$0xff] %v1527_v14  ;;  %v255_v39 = vadd.f32 %v254_v20, %v1206_v6  ;;  %v1574_v20 = vld [vmem:[%s1959_s3 + $0x210] sm:$0xff] }
  0xde   :  { %1997 = vst [vmem:[#allocation40_spill] sm:$0xff] %v1532_v32  ;;  %v214_v32 = vadd.f32 %v213_v60, %v1204_v5  ;;  %v1569_v60 = vld [vmem:[%s1959_s3 + $0x208] sm:$0xff] }
  0xdf   :  { %385 = vst [vmem:[#allocation3 + $0x98] sm:$0xff] %v296_v27  ;;  %v1554_v27 = vld [vmem:[%s1959_s3 + $0x1f0] sm:$0xff] }
  0xe0   :  { %1998 = vst [vmem:[#allocation41_spill] sm:$0xff] %v1537_v15  ;;  %v1559_v15 = vld [vmem:[%s1959_s3 + $0x1f8] sm:$0xff] }
  0xe1   :  { %386 = vst [vmem:[#allocation3 + $0xa0] sm:$0xff] %v337_v28  ;;  %v1579_v28 = vld [vmem:[%s1959_s3 + $0x218] sm:$0xff]  ;;  %v339_v56 = vpop.f32.mrf.mxu1 }
  0xe2   :  { %2000 = vst [vmem:[#allocation43_spill] sm:$0xff] %v1554_v27  ;;  %v1584_v27 = vld [vmem:[%s1959_s3 + $0x220] sm:$0xff]  ;;  %v340_v41 = vadd.f32 %v339_v56, %v1202_v4  ;;  %v1651_v4 = vld [vmem:[%s1959_s3 + $0x288] sm:$0xff]  ;;  %v1656_v56 = vld [vmem:[%s1959_s3 + $0x290] sm:$0xff] }
  0xe3   :  { %2001 = vst [vmem:[#allocation44_spill] sm:$0xff] %v1559_v15 }
  0xe4   :  { %2003 = vst [vmem:[#allocation46_spill] sm:$0xff] %v1569_v60  ;;  %v1589_v60 = vld [vmem:[%s1959_s3 + $0x228] sm:$0xff]  ;;  %v257_v49 = vpop.f32.mrf.mxu3 }
  0xe5   :  { %2004 = vst [vmem:[#allocation47_spill] sm:$0xff] %v1574_v20  ;;  %v258_v19 = vadd.f32 %v257_v49, %v1206_v6  ;;  %v1698_v6 = vld [vmem:[%s1959_s3 + $0x2d0] sm:$0xff]  ;;  %v1708_v49 = vld [vmem:[%s1959_s3 + $0x2e0] sm:$0xff] }
  0xe6   :  { %2005 = vst [vmem:[#allocation48_spill] sm:$0xff] %v1579_v28  ;;  %v298_v28 = vpop.f32.mrf.mxu0 }
  0xe7   :  { %362 = vst [vmem:[#allocation2 + $0xa0] sm:$0xff] %v214_v32  ;;  %v1599_v32 = vld [vmem:[%s1959_s3 + $0x238] sm:$0xff]  ;;  %v299_v40 = vadd.f32 %v298_v28, %v1200_v3  ;;  %v1646_v3 = vld [vmem:[%s1959_s3 + $0x280] sm:$0xff]  ;;  %v216_v28 = vpop.f32.mrf.mxu2 }
  0xe8   :  { %2006 = vst [vmem:[#allocation49_spill] sm:$0xff] %v1584_v27  ;;  %v1604_v27 = vld [vmem:[%s1959_s3 + $0x240] sm:$0xff] }
  0xe9   :  { %384 = vst [vmem:[#allocation3 + $0x90] sm:$0xff] %v255_v39  ;;  %v1614_v39 = vld [vmem:[%s1959_s3 + $0x250] sm:$0xff] }
  0xea   :  { %2008 = vst [vmem:[#allocation51_spill] sm:$0xff] %v1599_v32  ;;  %v1619_v32 = vld [vmem:[%s1959_s3 + $0x258] sm:$0xff] }
  0xeb   :  { %2010 = vst [vmem:[#allocation53_spill] sm:$0xff] %v1614_v39  ;;  %v1636_v39 = vld [vmem:[%s1959_s3 + $0x270] sm:$0xff] }
  0xec   :  { %2014 = vst [vmem:[#allocation57_spill] sm:$0xff] %v1646_v3  ;;  %v1666_v3 = vld [vmem:[%s1959_s3 + $0x2a0] sm:$0xff] }
  0xed   :  { %2015 = vst [vmem:[#allocation58_spill] sm:$0xff] %v1651_v4 }
  0xee   :  { %2016 = vst [vmem:[#allocation59_spill] sm:$0xff] %v1656_v56  ;;  %v217_v56 = vadd.f32 %v216_v28, %v1204_v5  ;;  %v1693_v5 = vld [vmem:[%s1959_s3 + $0x2c8] sm:$0xff] }
  0xef   :  { %388 = vst [vmem:[#allocation3 + $0xb0] sm:$0xff] %v299_v40  ;;  %v1678_v40 = vld [vmem:[%s1959_s3 + $0x2b0] sm:$0xff]  ;;  %v1713_v28 = vld [vmem:[%s1959_s3 + $0x2e8] sm:$0xff] }
  0xf0   :  { %2017 = vst [vmem:[#allocation60_spill] sm:$0xff] %v1661_v44  ;;  %v1683_v44 = vld [vmem:[%s1959_s3 + $0x2b8] sm:$0xff] }
  0xf1   :  { %2018 = vst [vmem:[#allocation61_spill] sm:$0xff] %v1666_v3 }
  0xf2   :  { %2019 = vst [vmem:[#allocation62_spill] sm:$0xff] %v1671_v46  ;;  %v1733_v46 = vld [vmem:[%s1956_s5 + $0x1] ss:$0 sm:$0xff] }
  0xf3   :  { %389 = vst [vmem:[#allocation3 + $0xb8] sm:$0xff] %v340_v41  ;;  %v1703_v41 = vld [vmem:[%s1959_s3 + $0x2d8] sm:$0xff] }
  0xf4   :  { %2020 = vst [vmem:[#allocation63_spill] sm:$0xff] %v1678_v40  ;;  %v1718_v40 = vld [vmem:[%s1959_s3 + $0x2f0] sm:$0xff] }
  0xf5   :  { %2021 = vst [vmem:[#allocation64_spill] sm:$0xff] %v1688_v45  ;;  %v1737_v45 = vmov 0.0  }
  0xf6   :  { %2022 = vst [vmem:[#allocation65_spill] sm:$0xff] %v1693_v5  ;;  %v1728_v5 = vld [vmem:[%s1956_s5] ss:$0 sm:$0xff] }
  0xf7   :  { %2023 = vst [vmem:[#allocation66_spill] sm:$0xff] %v1698_v6 }
  0xf8   :  { %365 = vst [vmem:[#allocation2 + $0xb8] sm:$0xff] %v217_v56  ;;  %v1723_v56 = vld [vmem:[%s1959_s3 + $0x2f8] sm:$0xff] }
  0xf9   :  { %2024 = vst [vmem:[#allocation67_spill] sm:$0xff] %v1708_v49  ;;  %v1735_v49 = vmov 0.0  }
  0xfa   :  { %387 = vst [vmem:[#allocation3 + $0xa8] sm:$0xff] %v258_v19 }
  0xfb   :  { %2025 = vst [vmem:[#allocation68_spill] sm:$0xff] %v1728_v5 }
  0xfc LB: > { %517 = vmatpush.msra.mxu0 %v1465_v47  ;;  %577 = vmatpush.msra.mxu3 %v1713_v28  ;;  %v2027_v3 = vld [vmem:[#allocation61_spill] sm:$0xff]  ;;  %v2029_v4 = vld [vmem:[#allocation58_spill] sm:$0xff]  ;;  %v2032_v23 = vld [vmem:[#allocation27_spill] sm:$0xff]  ;;  %s1823_s3 = ssub.s32 7, %s1002_s1  ;;  %s922_s5 = smul.u32 24, %s1002_s1  ;;  %s1002_s1 = sphi %s1739_s1, %s501_s1   ;;  %v998_v45 = vphi %v1737_v45, %v2095_v45   ;;  %v994_v49 = vphi %v1735_v49, %v2094_v49  }
  0xfd   : > { %537 = vmatpush.msra.mxu1 %v1470_v48  ;;  %557 = vmatpush.msra.mxu2 %v1475_v55  ;;  %v2028_v25 = vld [vmem:[#allocation29_spill] sm:$0xff]  ;;  %v2030_v26 = vld [vmem:[#allocation30_spill] sm:$0xff]  ;;  %v2033_v24 = vld [vmem:[#allocation28_spill] sm:$0xff]  ;;  %s923_s27 = smul.u32 24, %s1823_s3  ;;  %s920_s30 = sshll.u32 %s1002_s1, 3 }
  0xfe   : > { %518 = vmatpush.msra.mxu0 %v1450_v38  ;;  %v2026_v6 = vld [vmem:[#allocation66_spill] sm:$0xff]  ;;  %v2034_v17 = vld [vmem:[#allocation23_spill] sm:$0xff]  ;;  %v2035_v18 = vld [vmem:[#allocation24_spill] sm:$0xff]  ;;  %s1861_s28 = scalar_lea.vmem [#allocation2], %s922_s5  ;;  %s744_s10 = scalar_lea.vmem %s1953_s6, %s920_s30 }
  0xff   : > { %578 = vmatpush.msra.mxu3 %v2026_v6  ;;  %538 = vmatpush.msra.mxu1 %v1455_v42  ;;  %v2031_v22 = vld [vmem:[#allocation26_spill] sm:$0xff]  ;;  %v2036_v21 = vld [vmem:[#allocation25_spill] sm:$0xff]  ;;  %v2037_v12 = vld [vmem:[#allocation20_spill] sm:$0xff]  ;;  %s1865_s29 = scalar_lea.vmem [#allocation3], %s923_s27  ;;  %s921_s11 = sshll.u32 %s1823_s3, 3 }
 0x100   : > { %558 = vmatpush.msra.mxu2 %v1460_v43  ;;  %519 = vmatpush.msra.mxu0 %v1435_v35  ;;  %v2038_v13 = vld [vmem:[#allocation21_spill] sm:$0xff]  ;;  %v2039_v16 = vld [vmem:[#allocation22_spill] sm:$0xff]  ;;  %v2042_v11 = vld [vmem:[#allocation19_spill] sm:$0xff]  ;;  %s753_s12 = scalar_lea.vmem [#allocation4], %s921_s11 }
 0x101   : > { %579 = vmatpush.msra.mxu3 %v1683_v44  ;;  %539 = vmatpush.msra.mxu1 %v1440_v36  ;;  %v2040_v9 = vld [vmem:[#allocation17_spill] sm:$0xff]  ;;  %v2041_v10 = vld [vmem:[#allocation18_spill] sm:$0xff]  ;;  %v2044_v20 = vld [vmem:[#allocation47_spill] sm:$0xff] }
 0x102   : > { %559 = vmatpush.msra.mxu2 %v1445_v37  ;;  %520 = vmatpush.msra.mxu0 %v1418_v30  ;;  %v2043_v2 = vld [vmem:[#allocation14_spill] sm:$0xff]  ;;  %v2045_v7 = vld [vmem:[#allocation15_spill] sm:$0xff]  ;;  %v2046_v8 = vld [vmem:[#allocation16_spill] sm:$0xff] }
 0x103   : > { %580 = vmatpush.msra.mxu3 %v2027_v3  ;;  %540 = vmatpush.msra.mxu1 %v1423_v31  ;;  %v2047_v15 = vld [vmem:[#allocation44_spill] sm:$0xff]  ;;  %v2049_v1 = vld [vmem:[#allocation13_spill] sm:$0xff]  ;;  %v2050_v14 = vld [vmem:[#allocation39_spill] sm:$0xff] }
 0x104   : > { %560 = vmatpush.msra.mxu2 %v1430_v34  ;;  %521 = vmatpush.msra.mxu0 %v2028_v25  ;;  %v2048_v0 = vld [vmem:[#allocation12_spill] sm:$0xff]  ;;  %v2051_v19 = vld [vmem:[#allocation9_spill] sm:$0xff]  ;;  %v2055_v3 = vld [vmem:[#allocation6_spill] sm:$0xff] }
 0x105   : > { %581 = vmatpush.msra.mxu3 %v2029_v4  ;;  %541 = vmatpush.msra.mxu1 %v2030_v26  ;;  %v2056_v4 = vld [vmem:[#allocation31_spill] sm:$0xff]  ;;  %v2091_v5 = vld [vmem:[#allocation68_spill] sm:$0xff] }
 0x106   : > { %561 = vmatpush.msra.mxu2 %v1413_v29  ;;  %522 = vmatpush.msra.mxu0 %v2031_v22  ;;  %v2057_v6 = vld [vmem:[#allocation7_spill] sm:$0xff] }
 0x107   : > { %582 = vmatpush.msra.mxu3 %v1636_v39  ;;  %542 = vmatpush.msra.mxu1 %v2032_v23  ;;  %v510_v23 = vld [vmem:[%s1861_s28 + $0x10] sm:$0xff] }
 0x108   : > { %562 = vmatpush.msra.mxu2 %v2033_v24  ;;  %523 = vmatpush.msra.mxu0 %v2034_v17 }
 0x109   : > { %583 = vmatpush.msra.mxu3 %v1619_v32  ;;  %543 = vmatpush.msra.mxu1 %v2035_v18 }
 0x10a   : > { %563 = vmatpush.msra.mxu2 %v2036_v21  ;;  %524 = vmatpush.msra.mxu0 %v2037_v12 }
 0x10b   : > { %584 = vmatpush.msra.mxu3 %v1604_v27  ;;  %544 = vmatpush.msra.mxu1 %v2038_v13 }
 0x10c   : > { %564 = vmatpush.msra.mxu2 %v2039_v16  ;;  %525 = vmatpush.msra.mxu0 %v2040_v9  ;;  %v2064_v9 = vld [vmem:[#allocation59_spill] sm:$0xff] }
 0x10d   : > { %585 = vmatpush.msra.mxu3 %v1589_v60  ;;  %545 = vmatpush.msra.mxu1 %v2041_v10  ;;  %v2068_v10 = vld [vmem:[#allocation54_spill] sm:$0xff] }
 0x10e   : > { %565 = vmatpush.msra.mxu2 %v2042_v11  ;;  %526 = vmatpush.msra.mxu0 %v2043_v2  ;;  %v2054_v2 = vld [vmem:[#allocation11_spill] sm:$0xff]  ;;  %v2069_v11 = vld [vmem:[#allocation57_spill] sm:$0xff] }
 0x10f   : > { %586 = vmatpush.msra.mxu3 %v2044_v20  ;;  %546 = vmatpush.msra.mxu1 %v2045_v7  ;;  %v2062_v7 = vld [vmem:[#allocation62_spill] sm:$0xff] }
 0x110   : > { %566 = vmatpush.msra.mxu2 %v2046_v8  ;;  %527 = vmatpush.msra.mxu0 %v1311_v63  ;;  %v2063_v8 = vld [vmem:[#allocation65_spill] sm:$0xff] }
 0x111   : > { %587 = vmatpush.msra.mxu3 %v2047_v15  ;;  %547 = vmatpush.msra.mxu1 %v2048_v0  ;;  %v2052_v0 = vld [vmem:[#allocation34_spill] sm:$0xff] }
 0x112   : > { %567 = vmatpush.msra.mxu2 %v2049_v1  ;;  %528 = vmatpush.msra.mxu0 %v1294_v58  ;;  %v2053_v1 = vld [vmem:[#allocation10_spill] sm:$0xff] }
 0x113   : > { %588 = vmatpush.msra.mxu3 %v1542_v61  ;;  %548 = vmatpush.msra.mxu1 %v1299_v59 }
 0x114   : > { %568 = vmatpush.msra.mxu2 %v1306_v62  ;;  %529 = vmatpush.msra.mxu0 %v1279_v53 }
 0x115   : > { %589 = vmatpush.msra.mxu3 %v2050_v14  ;;  %549 = vmatpush.msra.mxu1 %v1284_v54 }
 0x116   : > { %569 = vmatpush.msra.mxu2 %v1289_v57  ;;  %530 = vmatpush.msra.mxu0 %v1264_v50 }
 0x117   : > { %590 = vmatpush.msra.mxu3 %v1512_v33  ;;  %550 = vmatpush.msra.mxu1 %v1269_v51 }
 0x118   : > { %570 = vmatpush.msra.mxu2 %v1274_v52  ;;  %531 = vmatpush.msra.mxu0 %v2051_v19  ;;  %v733_v19 = vstv %s1002_s1  ;;  %s501_s1 = sadd.s32 1, %s1002_s1  }
 0x119   : > { %591 = vmatpush.msra.mxu3 %v2052_v0  ;;  %551 = vmatpush.msra.mxu1 %v2053_v1  ;;  %v2058_v0 = vld [vmem:[#allocation5_spill] sm:$0xff]  ;;  %v2059_v1 = vld [vmem:[#allocation8_spill] sm:$0xff]  ;;  %p498_p0 = scmp.ge.s32.totalorder %s501_s1, 8  }
 0x11a   : > { %571 = vmatpush.msra.mxu2 %v2054_v2  ;;  %532 = vmatpush.msra.mxu0 %v2055_v3  ;;  %vm734_vm1 = vcmp.lt.s32.totalorder %v733_v19, %v2058_v0  ;;  %v2060_v2 = vld [vmem:[#allocation64_spill] sm:$0xff]  ;;  %v2061_v3 = vld [vmem:[#allocation67_spill] sm:$0xff]  ;;  %v735_v19 = vstv %s1823_s3 }
 0x11b   : > { %592 = vmatpush.msra.mxu3 %v2056_v4  ;;  %552 = vmatpush.msra.mxu1 %v2057_v6  ;;  %v1004_v4 = vmov 0   ;;  %vm736_vm2 = vcmp.lt.s32.totalorder %v735_v19, %v2058_v0  ;;  %v2075_v19 = vld [vmem:[#allocation51_spill] sm:$0xff] }
 0x11c   : > { %597 = vmatpush.msrb.mxu0 %v1718_v40  ;;  %593 = vmatmul.f32.vlgmr.msra.gmra.mxu3 %v994_v49  ;;  %v737_v6 = vsel %vm734_vm1, 1, %v1004_v4  ;;  %v746_v12 = vsel %vm736_vm2, 1, %v1004_v4 }
 0x11d   : > { %533 = vmatmul.f32.vlgmr.msra.gmra.mxu0 %v998_v45  ;;  %617 = vmatpush.msrb.mxu1 %v1723_v56 }
 0x11e   : > { %598 = vmatpush.msrb.mxu0 %v1703_v41  ;;  %553 = vmatmul.f32.vlgmr.msra.gmra.mxu1 %v998_v45 }
 0x11f   : > { %572 = vmatpush.msra.mxu2 %v2059_v1  ;;  %618 = vmatpush.msrb.mxu1 %v2061_v3  ;;  %v2065_v1 = vld [vmem:[#allocation63_spill] sm:$0xff]  ;;  %v2067_v3 = vld [vmem:[#allocation60_spill] sm:$0xff] }
 0x120   : > { %599 = vmatpush.msrb.mxu0 %v2060_v2  ;;  %573 = vmatmul.f32.vlgmr.msra.gmra.mxu2 %v998_v45  ;;  %v2066_v2 = vld [vmem:[#allocation56_spill] sm:$0xff] }
 0x121   : > { %959 = vset.pattern.permute.xlu0 %v1004_v4  ;;  %619 = vmatpush.msrb.mxu1 %v2063_v8  ;;  %v2071_v8 = vld [vmem:[#allocation55_spill] sm:$0xff]  ;;  %v2079_v4 = vld [vmem:[#allocation46_spill] sm:$0xff] }
 0x122   : > { %600 = vmatpush.msrb.mxu0 %v2062_v7  ;;  %739 = vperm.xlu0 %959, %v737_v6   ;;  %v2070_v7 = vld [vmem:[#allocation52_spill] sm:$0xff]  ;;  %v2072_v6 = vld [vmem:[#allocation50_spill] sm:$0xff] }
 0x123   : > { %620 = vmatpush.msrb.mxu1 %v2065_v1  ;;  %v2074_v1 = vld [vmem:[#allocation48_spill] sm:$0xff] }
 0x124   : > { %601 = vmatpush.msrb.mxu0 %v2064_v9  ;;  %v2073_v9 = vld [vmem:[#allocation53_spill] sm:$0xff] }
 0x125   : > { %621 = vmatpush.msrb.mxu1 %v2067_v3  ;;  %v2080_v3 = vld [vmem:[#allocation40_spill] sm:$0xff] }
 0x126   : > { %602 = vmatpush.msrb.mxu0 %v2066_v2  ;;  %v2076_v2 = vld [vmem:[#allocation45_spill] sm:$0xff] }
 0x127   : > { %622 = vmatpush.msrb.mxu1 %v2069_v11  ;;  %v2078_v11 = vld [vmem:[#allocation42_spill] sm:$0xff] }
 0x128   : > { %603 = vmatpush.msrb.mxu0 %v2068_v10  ;;  %v2077_v10 = vld [vmem:[#allocation49_spill] sm:$0xff] }
 0x129   : > { %623 = vmatpush.msrb.mxu1 %v2071_v8  ;;  %v2083_v8 = vld [vmem:[#allocation41_spill] sm:$0xff] }
 0x12a   : > { %604 = vmatpush.msrb.mxu0 %v2070_v7  ;;  %748 = vperm.xlu0 %959, %v746_v12   ;;  %v2081_v12 = vld [vmem:[#allocation43_spill] sm:$0xff]  ;;  %v2082_v7 = vld [vmem:[#allocation37_spill] sm:$0xff] }
 0x12b   : > { %624 = vmatpush.msrb.mxu1 %v2073_v9  ;;  %v2085_v9 = vld [vmem:[#allocation38_spill] sm:$0xff] }
 0x12c   : > { %605 = vmatpush.msrb.mxu0 %v2072_v6  ;;  %v2084_v6 = vld [vmem:[#allocation35_spill] sm:$0xff] }
 0x12d   : > { %625 = vmatpush.msrb.mxu1 %v2075_v19  ;;  %v2087_v19 = vld [vmem:[#allocation36_spill] sm:$0xff] }
 0x12e   : > { %606 = vmatpush.msrb.mxu0 %v2074_v1  ;;  %v2086_v1 = vld [vmem:[#allocation32_spill] sm:$0xff] }
 0x12f   : > { %626 = vmatpush.msrb.mxu1 %v2077_v10  ;;  %v508_v10 = vld [vmem:[%s1861_s28] sm:$0xff] }
 0x130   : > { %607 = vmatpush.msrb.mxu0 %v2076_v2  ;;  %v2088_v2 = vld [vmem:[#allocation33_spill] sm:$0xff] }
 0x131   : > { %627 = vmatpush.msrb.mxu1 %v2079_v4  ;;  %v509_v4 = vld [vmem:[%s1861_s28 + $0x8] sm:$0xff] }
 0x132   : > { %608 = vmatpush.msrb.mxu0 %v2078_v11 }
 0x133   : > { %628 = vmatpush.msrb.mxu1 %v2081_v12 }
 0x134   : > { %609 = vmatpush.msrb.mxu0 %v2080_v3 }
 0x135   : > { %629 = vmatpush.msrb.mxu1 %v2083_v8  ;;  %v514_v8 = vld [vmem:[%s1865_s29] sm:$0xff] }
 0x136   : > { %610 = vmatpush.msrb.mxu0 %v2082_v7 }
 0x137   : > { %630 = vmatpush.msrb.mxu1 %v2085_v9 }
 0x138   : > { %611 = vmatpush.msrb.mxu0 %v2084_v6 }
 0x139   : > { %631 = vmatpush.msrb.mxu1 %v2087_v19 }
 0x13a   : > { %612 = vmatpush.msrb.mxu0 %v2086_v1 }
 0x13b   : > { %613 = vmatmul.f32.vlgmr.msrb.gmra.mxu0 %v994_v49  ;;  %632 = vmatpush.msrb.mxu1 %v2088_v2 }
 0x13c   : > { %633 = vmatmul.f32.vlgmr.msrb.gmra.mxu1 %v994_v49 }
 0x19a   : > { %v534_v11 = vpop.f32.mrf.mxu0 }
 0x19b   : > { %v637_v3 = vadd.f32 %v534_v11, %v508_v10  ;;  %v554_v12 = vpop.f32.mrf.mxu1 }
 0x19c   : > { %v657_v6 = vadd.f32 %v554_v12, %v509_v4 }
 0x19d   : > { %v916_v7 = vmul.f32 -1.442695, %v637_v3 }
 0x19e   : > { %v917_v1 = vmul.f32 -1.442695, %v657_v6 }
 0x19f   : > { %960 = vpow2.f32 %v916_v7  ;;  %v594_v9 = vpop.f32.mrf.mxu3 }
 0x1a0   : > { %v685_v19 = vadd.f32 %v594_v9, %v514_v8  ;;  %962 = vpow2.f32 %v917_v1 }
 0x1a2   : > { %v918_v2 = vmul.f32 -1.442695, %v685_v19 }
 0x1a3   : > { %v574_v6 = vpop.f32.mrf.mxu2 }
 0x1a4   : > { %964 = vpow2.f32 %v918_v2  ;;  %v677_v2 = vadd.f32 %v2091_v5, %v574_v6 }
 0x1a5   : > { %v961_v0 = vpop.eup %960 }
 0x1a6   : > { %v641_v13 = vadd.f32 1.0, %v961_v0  ;;  %v963_v14 = vpop.eup %962 }
 0x1a7   : > { %v661_v15 = vadd.f32 1.0, %v963_v14 }
 0x1a8   : > { %966 = vrcp.f32 %v641_v13  ;;  %v651_v4 = vand.u32 2147483647, %v641_v13  ;;  %v653_v12 = vand.u32 2147483648, %v641_v13  ;;  %vm647_vm3 = vweird.f32 %v641_v13 }
 0x1a9   : > { %968 = vrcp.f32 %v661_v15  ;;  %vm667_vm7 = vweird.f32 %v661_v15  ;;  %v671_v21 = vand.u32 2147483647, %v661_v15 }
 0x1aa   : > { %v965_v10 = vpop.eup %964  ;;  %vm652_vm6 = vcmp.eq.f32.partialorder %v651_v4, 8.507059e+37  ;;  %v654_v19 = vor.u32 1.1754944e-38, %v653_v12 }
 0x1ab   : > { %v689_v11 = vadd.f32 1.0, %v965_v10  ;;  %vm672_vm10 = vcmp.eq.f32.partialorder %v671_v21, 8.507059e+37 }
 0x1ad   : > { %970 = vrcp.f32 %v689_v11  ;;  %vm695_vm11 = vweird.f32 %v689_v11 }
 0x1ae   : > { %v967_v3 = vpop.eup %966 }
 0x1af   : > { %v643_v16 = vmul.f32 %v967_v3, %v641_v13  ;;  %v969_v17 = vpop.eup %968  ;;  %vm648_vm4 = vweird.f32 %v967_v3  ;;  %v673_v13 = vand.u32 2147483648, %v661_v15 }
 0x1b0   : > { %v663_v7 = vmul.f32 %v969_v17, %v661_v15  ;;  %vm1868_vm5 = vmor %vm647_vm3, %vm648_vm4  ;;  %vm668_vm8 = vweird.f32 %v969_v17  ;;  %v701_v15 = vand.u32 2147483648, %v689_v11 }
 0x1b1   : > { %v644_v8 = vsub.f32 1.0, %v643_v16  ;;  %v515_v16 = vld [vmem:[%s1865_s29 + $0x8] sm:$0xff]  ;;  %vm669_vm9 = vmor %vm667_vm7, %vm668_vm8  ;;  %v674_v6 = vor.u32 1.1754944e-38, %v673_v13 }
 0x1b2   : > { %v664_v0 = vsub.f32 1.0, %v663_v7 }
 0x1b3   : > { %v971_v9 = vpop.eup %970  ;;  %v645_v1 = vmul.f32 %v967_v3, %v644_v8 }
 0x1b4   : > { %v691_v10 = vmul.f32 %v971_v9, %v689_v11  ;;  %v665_v20 = vmul.f32 %v969_v17, %v664_v0  ;;  %vm696_vm12 = vweird.f32 %v971_v9 }
 0x1b5   : > { %v646_v18 = vadd.f32 %v967_v3, %v645_v1  ;;  %vm1877_vm13 = vmor %vm695_vm11, %vm696_vm12 }
 0x1b6   : > { %v666_v8 = vadd.f32 %v969_v17, %v665_v20  ;;  %v692_v25 = vsub.f32 1.0, %v691_v10 }
 0x1b7   : > { %v650_v7 = vsel %vm1868_vm5, %v967_v3, %v646_v18  ;;  %v699_v3 = vand.u32 2147483647, %v689_v11 }
 0x1b8   : > { %v614_v22 = vpop.f32.mrf.mxu0  ;;  %v655_v24 = vsel %vm652_vm6, %v654_v19, %v650_v7  ;;  %v670_v0 = vsel %vm669_vm9, %v969_v17, %v666_v8  ;;  %v693_v26 = vmul.f32 %v971_v9, %v692_v25  ;;  %v740_v17 = vpop.permute.xlu0 %739 }
 0x1b9   : > { %v705_v4 = vadd.f32 %v614_v22, %v515_v16  ;;  %v678_v12 = vmul.f32 %v677_v2, %v655_v24  ;;  %v675_v18 = vsel %vm672_vm10, %v674_v6, %v670_v0  ;;  %v634_v19 = vpop.f32.mrf.mxu1  ;;  %vm700_vm14 = vcmp.eq.f32.partialorder %v699_v3, 8.507059e+37 }
 0x1ba   : > { %v694_v20 = vadd.f32 %v971_v9, %v693_v26  ;;  %v681_v22 = vsub.f32 1.0, %v675_v18  ;;  %v683_v21 = vmul.f32 %v998_v45, %v675_v18  ;;  %v725_v11 = vadd.f32 %v1733_v46, %v634_v19 }
 0x1bb   : > { %v919_v5 = vmul.f32 -1.442695, %v705_v4  ;;  %v679_v1 = vadd.f32 %v678_v12, %v510_v23  ;;  %v702_v23 = vor.u32 1.1754944e-38, %v701_v15  ;;  %vm741_vm15 = vcmp.eq.s32.totalorder %v740_v17, 1  ;;  %v516_v4 = vld [vmem:[%s1865_s29 + $0x10] sm:$0xff] }
 0x1bc   : > { %v698_v2 = vsel %vm1877_vm13, %v971_v9, %v694_v20 }
 0x1bd   : > { %972 = vpow2.f32 %v919_v5  ;;  %v703_v10 = vsel %vm700_vm14, %v702_v23, %v698_v2 }
 0x1be   : > { %974 = vtanh.f32 %v679_v1  ;;  %v726_v8 = vmul.f32 %v725_v11, %v703_v10 }
 0x1c0   : > { %v727_v6 = vadd.f32 %v726_v8, %v516_v4  ;;  %v749_v19 = vpop.permute.xlu0 %748 }
 0x1c1   : > { %vm750_vm4 = vcmp.eq.s32.totalorder %v749_v19, 1 }
 0x1c3   : > { %v973_v24 = vpop.eup %972 }
 0x1c4   : > { %v975_v25 = vpop.eup %974  ;;  %v709_v5 = vadd.f32 1.0, %v973_v24 }
 0x1c5   : > { %v682_v26 = vmul.f32 %v975_v25, %v681_v22 }
 0x1c6   : > { %976 = vrcp.f32 %v709_v5  ;;  %v721_v0 = vand.u32 2147483648, %v709_v5  ;;  %v719_v15 = vand.u32 2147483647, %v709_v5  ;;  %vm715_vm1 = vweird.f32 %v709_v5 }
 0x1c7   : > { %v684_v16 = vadd.f32 %v683_v21, %v682_v26  ;;  %978 = vtanh.f32 %v727_v6 }
 0x1c8   : > { %v722_v3 = vor.u32 1.1754944e-38, %v721_v0  ;;  %vm720_vm3 = vcmp.eq.f32.partialorder %v719_v15, 8.507059e+37 }
 0x1c9   : > { %v742_v13 = vsel %vm741_vm15, %v684_v16, 0.0  ;;  %v755_v7 = vsel %vm741_vm15, %v684_v16, %v998_v45  }
 0x1ca   : > { %745 = vst [vmem:[%s744_s10] sm:$0xff] %v742_v13 }
 0x1cc   : > { %v977_v9 = vpop.eup %976 }
 0x1cd   : > { %v711_v12 = vmul.f32 %v977_v9, %v709_v5  ;;  %vm716_vm0 = vweird.f32 %v977_v9  ;;  %v979_v24 = vpop.eup %978 }
 0x1ce   : > { %vm717_vm2 = vmor %vm715_vm1, %vm716_vm0 }
 0x1cf   : > { %v712_v1 = vsub.f32 1.0, %v711_v12 }
 0x1d1   : > { %v713_v18 = vmul.f32 %v977_v9, %v712_v1  ;;  %v757_v5 = vld [vmem:[%s1953_s6] sm:$0xff] (%p498_p0)  ;;  %v758_v11 = vld [vmem:[%s1953_s6 + $0x8] sm:$0xff] (%p498_p0)  ;;  %v759_v8 = vld [vmem:[%s1953_s6 + $0x10] sm:$0xff] (%p498_p0) }
 0x1d2   :  { %v760_v44 = vld [vmem:[%s1953_s6 + $0x18] sm:$0xff] (%p498_p0)  ;;  %v761_v50 = vld [vmem:[%s1953_s6 + $0x20] sm:$0xff] (%p498_p0)  ;;  %v762_v53 = vld [vmem:[%s1953_s6 + $0x28] sm:$0xff] (%p498_p0) }
 0x1d3   : > { %v714_v20 = vadd.f32 %v977_v9, %v713_v18  ;;  %v763_v59 = vld [vmem:[%s1953_s6 + $0x30] sm:$0xff] (%p498_p0)  ;;  %v764_v63 = vld [vmem:[%s1953_s6 + $0x38] sm:$0xff] (%p498_p0) }
 0x1d5   : > { %v718_v14 = vsel %vm717_vm2, %v977_v9, %v714_v20 }
 0x1d6   : > { %v723_v45 = vsel %vm720_vm3, %v722_v3, %v718_v14 }
 0x1d7   : > { %v729_v22 = vsub.f32 1.0, %v723_v45  ;;  %v731_v17 = vmul.f32 %v994_v49, %v723_v45  ;;  %v2095_v45 = vmov %v755_v7 }
 0x1d9   : > { %v730_v23 = vmul.f32 %v979_v24, %v729_v22 }
 0x1da   :  { %500 = sbr.rel (!%p498_p0) target bundleno = 252 (0xfc), region = 64 }
 0x1db   : > { %v732_v21 = vadd.f32 %v731_v17, %v730_v23 }
 0x1dd   : > { %v751_v25 = vsel %vm750_vm4, %v732_v21, 0.0  ;;  %v756_v2 = vsel %vm750_vm4, %v732_v21, %v994_v49  }
 0x1de   : > { %754 = vst [vmem:[%s753_s12] sm:$0xff] %v751_v25  ;;  %v2094_v49 = vmov %v756_v2  ;;  %v789_v10 = vadd.f32 (%p498_p0), %v756_v2, %v755_v7 }
 0x1e0   :  { %790 = vst [vmem:[%s1954_s7] sm:$0xff] %v789_v10 }
 0x1e5   :  { %v765_v26 = vld [vmem:[#allocation4] sm:$0xff]  ;;  %v766_v13 = vld [vmem:[#allocation4 + $0x8] sm:$0xff]  ;;  %v767_v4 = vld [vmem:[#allocation4 + $0x10] sm:$0xff] }
 0x1e6   :  { %v773_v16 = vadd.f32 %v765_v26, %v757_v5  ;;  %v774_v9 = vadd.f32 %v766_v13, %v758_v11  ;;  %v775_v12 = vadd.f32 %v767_v4, %v759_v8  ;;  %v768_v46 = vld [vmem:[#allocation4 + $0x18] sm:$0xff]  ;;  %v769_v52 = vld [vmem:[#allocation4 + $0x20] sm:$0xff]  ;;  %v770_v54 = vld [vmem:[#allocation4 + $0x28] sm:$0xff] }
 0x1e7   :  { %v776_v51 = vadd.f32 %v768_v46, %v760_v44  ;;  %v777_v57 = vadd.f32 %v769_v52, %v761_v50  ;;  %v778_v58 = vadd.f32 %v770_v54, %v762_v53  ;;  %v771_v62 = vld [vmem:[#allocation4 + $0x30] sm:$0xff]  ;;  %v772_v30 = vld [vmem:[#allocation4 + $0x38] sm:$0xff] }
 0x1e8   :  { %781 = vst [vmem:[%s1953_s6] sm:$0xff] %v773_v16  ;;  %v779_v29 = vadd.f32 %v771_v62, %v763_v59  ;;  %v780_v31 = vadd.f32 %v772_v30, %v764_v63 }
 0x1e9   :  { %782 = vst [vmem:[%s1953_s6 + $0x8] sm:$0xff] %v774_v9 }
 0x1ea   :  { %783 = vst [vmem:[%s1953_s6 + $0x10] sm:$0xff] %v775_v12 }
 0x1eb   :  { %784 = vst [vmem:[%s1953_s6 + $0x18] sm:$0xff] %v776_v51 }
 0x1ec   :  { %785 = vst [vmem:[%s1953_s6 + $0x20] sm:$0xff] %v777_v57 }
 0x1ed   :  { %786 = vst [vmem:[%s1953_s6 + $0x28] sm:$0xff] %v778_v58 }
 0x1ee   :  { %787 = vst [vmem:[%s1953_s6 + $0x30] sm:$0xff] %v779_v29 }
 0x1ef   :  { %788 = vst [vmem:[%s1953_s6 + $0x38] sm:$0xff] %v780_v31 }

</bundles_post_ra>
